<compile_context>
chip_gen: v5e
topology: v5e:2x2
jax: 0.10.0
libtpu: 0.0.40
codegen_flags: <defaults>
</compile_context>

<pallas_src>
import jax
import jax.numpy as jnp
from jax.experimental import pallas as pl
from jax.experimental.pallas import tpu as pltpu

H = 768            # hidden size (nn.Linear(768, 768))
NUM_LABELS = 2     # out_proj: nn.Linear(768, 2)
MAX_TB = 128       # batch tile for the 1-D grid


def _head_kernel(x_ref, w1_ref, b1_ref, w2_ref, b2_ref, out_ref):
    """out = tanh(x @ W1 + b1) @ W2 + b2 for one batch tile.

    x_ref:   (TB, H)           bfloat16  -- CLS-token features
    w1_ref:  (H, H)            bfloat16
    b1_ref:  (1, H)            float32
    w2_ref:  (H, NUM_LABELS)   bfloat16
    b2_ref:  (1, NUM_LABELS)   float32
    out_ref: (TB, NUM_LABELS)  float32
    """
    # dropout (p=0.1) is identity in eval mode.
    h = jnp.dot(x_ref[...], w1_ref[...], preferred_element_type=jnp.float32)
    h = jnp.tanh(h + b1_ref[...])                            # f32 bias+tanh (v5e-safe)
    # dropout again -> identity.
    logits = jnp.dot(h.astype(jnp.bfloat16), w2_ref[...],
                     preferred_element_type=jnp.float32) + b2_ref[...]
    out_ref[...] = logits.astype(out_ref.dtype)


def _head_pallas_call(B):
    TB = B if B <= MAX_TB else MAX_TB
    grid = (pl.cdiv(B, TB),)
    cost = pl.CostEstimate(
        flops=2 * B * H * H + 2 * B * H * NUM_LABELS,
        transcendentals=B * H,
        bytes_accessed=(2 * (H * H + H * NUM_LABELS + B * H)        # bf16 W1, W2, x
                        + 4 * (H + NUM_LABELS + B * NUM_LABELS)),   # f32 b1, b2, out
    )
    return pl.pallas_call(
        _head_kernel,
        out_shape=jax.ShapeDtypeStruct((B, NUM_LABELS), jnp.float32),
        grid_spec=pltpu.PrefetchScalarGridSpec(
            num_scalar_prefetch=0,
            grid=grid,
            in_specs=[
                pl.BlockSpec((TB, H), lambda i: (i, 0)),            # x: tiled on batch
                pl.BlockSpec((H, H), lambda i: (0, 0)),             # W1: VMEM-resident
                pl.BlockSpec((1, H), lambda i: (0, 0)),             # b1: VMEM-resident
                pl.BlockSpec((H, NUM_LABELS), lambda i: (0, 0)),    # W2: full array (768, 2)
                pl.BlockSpec((1, NUM_LABELS), lambda i: (0, 0)),    # b2: full array (1, 2)
            ],
            out_specs=pl.BlockSpec((TB, NUM_LABELS), lambda i: (i, 0)),
        ),
        compiler_params=pltpu.CompilerParams(dimension_semantics=("parallel",)),
        cost_estimate=cost,
    )


@jax.jit
def codet5_classifier_logits(features, w1_bf16, b1, w2_bf16, b2):
    """RobertaClassificationHead on encoder output `features` (B, S, H)."""
    B = features.shape[0]
    assert features.shape[2] == H
    # Contiguous CLS slice in the wrapper (same jit), cast to bf16 so the
    # extra activation pass and the kernel's x DMA are half-sized.
    x_cls = features[:, 0, :].astype(jnp.bfloat16)
    return _head_pallas_call(B)(x_cls, w1_bf16, b1[None, :], w2_bf16, b2[None, :])


@jax.jit
def codet5_forward_with_loss(features, w1_bf16, b1, w2_bf16, b2, labels):
    """Mirrors CodeT5ForSequenceClassification.forward with labels (return_dict)."""
    logits = codet5_classifier_logits(features, w1_bf16, b1, w2_bf16, b2)
    logp = jax.nn.log_softmax(logits.reshape(-1, NUM_LABELS), axis=-1)
    nll = -jnp.take_along_axis(logp, labels.reshape(-1, 1), axis=-1)[:, 0]
    loss = jnp.mean(nll)
    return loss, logits


def codet5_for_sequence_classification(features, params, labels=None):
    """Returns (loss, logits); loss is None when labels is None."""
    if labels is None:
        logits = codet5_classifier_logits(
            features, params["w1_bf16"], params["b1"],
            params["w2_bf16"], params["b2"])
        return None, logits
    return codet5_forward_with_loss(
        features, params["w1_bf16"], params["b1"],
        params["w2_bf16"], params["b2"], labels)


def init_params(key):
    """Deterministic init matching the PyTorch parameter shapes.

    PyTorch nn.Linear stores weight as (out, in); we keep the transposed
    (in, out) layout so the kernel does x @ W directly.  Weights are stored
    in bfloat16 (halves the dominant W1 HBM DMA).  W2/b2 are kept at their
    true (768, 2)/(2,) shapes -- no lane padding in HBM.
    """
    k1, k2, k3, k4 = jax.random.split(key, 4)
    s1 = 1.0 / jnp.sqrt(jnp.float32(H))
    w1 = jax.random.uniform(k1, (H, H), jnp.float32, -s1, s1)
    b1 = jax.random.uniform(k2, (H,), jnp.float32, -s1, s1)
    w2 = jax.random.uniform(k3, (H, NUM_LABELS), jnp.float32, -s1, s1)
    b2 = jax.random.uniform(k4, (NUM_LABELS,), jnp.float32, -s1, s1)

    return {
        # f32 originals kept only for reference checking
        "w1_f32": w1, "w2_f32": w2,
        "w1_bf16": w1.astype(jnp.bfloat16),
        "b1": b1,
        "w2_bf16": w2.astype(jnp.bfloat16),
        "b2": b2,
    }


if __name__ == "__main__":
    key = jax.random.PRNGKey(0)
    k_feat, k_param, k_lab = jax.random.split(key, 3)

    B, S = 8, 8  # small batch / sequence; hidden must be 768 per the module
    # Stand-in for encoder(input_ids, attention_mask)[0]:
    features = jax.random.normal(k_feat, (B, S, H), dtype=jnp.float32)
    labels = jax.random.randint(k_lab, (B,), 0, NUM_LABELS)

    params = init_params(k_param)

    loss, logits = codet5_for_sequence_classification(features, params, labels=labels)
    logits = jax.block_until_ready(logits)
    loss = jax.block_until_ready(loss)
    assert logits.shape == (B, NUM_LABELS)

    # Reference 1 (tight): same bf16-quantized weights/activations, f32 accumulate.
    x_cls = features[:, 0, :]
    xb = x_cls.astype(jnp.bfloat16).astype(jnp.float32)
    w1f = params["w1_bf16"].astype(jnp.float32)
    w2f = params["w2_bf16"].astype(jnp.float32)
    h_ref = jnp.tanh(xb @ w1f + params["b1"])
    hb = h_ref.astype(jnp.bfloat16).astype(jnp.float32)
    ref_bf16 = hb @ w2f + params["b2"]
    assert jnp.allclose(logits, ref_bf16, atol=1e-3, rtol=1e-3)

    # Reference 2 (loose): full-f32 head, bounds the bf16 quantization error.
    ref_f32 = (jnp.tanh(x_cls @ params["w1_f32"] + params["b1"])
               @ params["w2_f32"] + params["b2"])
    assert jnp.allclose(logits, ref_f32, atol=0.5, rtol=0.1)

    # Loss reference
    logp_ref = jax.nn.log_softmax(ref_bf16, axis=-1)
    loss_ref = jnp.mean(-jnp.take_along_axis(logp_ref, labels[:, None], axis=-1)[:, 0])
    assert jnp.isfinite(loss)
    assert jnp.allclose(loss, loss_ref, atol=1e-3, rtol=1e-3)

    # Also exercise the labels=None path once.
    _, logits_only = codet5_for_sequence_classification(features, params, labels=None)
    jax.block_until_ready(logits_only)
    assert jnp.allclose(logits_only, logits, atol=1e-6)

    print("KERNEL_OK")
</pallas_src>

<mosaic_0001>
module attributes {stable_mosaic.version = 11 : i64} {
  func.func @_head_kernel(%arg0: i32, %arg1: memref<8x768xbf16, #tpu.memory_space<vmem>>, %arg2: memref<768x768xbf16, #tpu.memory_space<vmem>>, %arg3: memref<1x768xf32, #tpu.memory_space<vmem>>, %arg4: memref<768x2xbf16, #tpu.memory_space<vmem>>, %arg5: memref<1x2xf32, #tpu.memory_space<vmem>>, %arg6: memref<8x2xf32, #tpu.memory_space<vmem>>) attributes {dimension_semantics = [#tpu.dimension_semantics<parallel>], iteration_bounds = array<i64: 1>, scalar_prefetch = 0 : i64, scratch_operands = 0 : i64, tpu.core_type = #tpu.core_type<tc>, window_params = [{transform_indices = @transform_0, window_bounds = array<i64: 8, 768>}, {pipeline_mode = #tpu.pipeline_mode<synchronous>, transform_indices = @transform_1, window_bounds = array<i64: 768, 768>}, {pipeline_mode = #tpu.pipeline_mode<synchronous>, transform_indices = @transform_2, window_bounds = array<i64: 1, 768>}, {pipeline_mode = #tpu.pipeline_mode<synchronous>, transform_indices = @transform_3, window_bounds = array<i64: 768, 2>}, {pipeline_mode = #tpu.pipeline_mode<synchronous>, transform_indices = @transform_4, window_bounds = array<i64: 1, 2>}, {transform_indices = @transform_5, window_bounds = array<i64: 8, 2>}]} {
    %c0 = arith.constant 0 : index
    %c0_0 = arith.constant 0 : index
    %0 = vector.load %arg1[%c0, %c0_0] : memref<8x768xbf16, #tpu.memory_space<vmem>>, vector<8x768xbf16>
    %c0_1 = arith.constant 0 : index
    %c0_2 = arith.constant 0 : index
    %1 = vector.load %arg2[%c0_1, %c0_2] : memref<768x768xbf16, #tpu.memory_space<vmem>>, vector<768x768xbf16>
    %cst = arith.constant dense<0.000000e+00> : vector<8x768xf32>
    %2 = tpu.matmul %0, %1, %cst {dimension_numbers = #tpu.dot_dimension_numbers<[1], [0], [0], [1], [0, 0, 1, 1], [], []>} : vector<8x768xbf16>, vector<768x768xbf16>, vector<8x768xf32> -> vector<8x768xf32>
    %c0_3 = arith.constant 0 : index
    %c0_4 = arith.constant 0 : index
    %3 = vector.load %arg3[%c0_3, %c0_4] : memref<1x768xf32, #tpu.memory_space<vmem>>, vector<1x768xf32>
    %4 = vector.broadcast %3 : vector<1x768xf32> to vector<8x768xf32>
    %5 = arith.addf %2, %4 : vector<8x768xf32>
    %6 = math.tanh %5 : vector<8x768xf32>
    %7 = arith.truncf %6 : vector<8x768xf32> to vector<8x768xbf16>
    %c0_5 = arith.constant 0 : index
    %c0_6 = arith.constant 0 : index
    %8 = vector.load %arg4[%c0_5, %c0_6] : memref<768x2xbf16, #tpu.memory_space<vmem>>, vector<768x2xbf16>
    %cst_7 = arith.constant dense<0.000000e+00> : vector<8x2xf32>
    %9 = tpu.matmul %7, %8, %cst_7 {dimension_numbers = #tpu.dot_dimension_numbers<[1], [0], [0], [1], [0, 0, 1, 1], [], []>} : vector<8x768xbf16>, vector<768x2xbf16>, vector<8x2xf32> -> vector<8x2xf32>
    %c0_8 = arith.constant 0 : index
    %c0_9 = arith.constant 0 : index
    %10 = vector.load %arg5[%c0_8, %c0_9] : memref<1x2xf32, #tpu.memory_space<vmem>>, vector<1x2xf32>
    %11 = vector.broadcast %10 : vector<1x2xf32> to vector<8x2xf32>
    %12 = arith.addf %9, %11 : vector<8x2xf32>
    %c0_10 = arith.constant 0 : index
    %c0_11 = arith.constant 0 : index
    %13 = vector.load %arg6[%c0_10, %c0_11] : memref<8x2xf32, #tpu.memory_space<vmem>>, vector<8x2xf32>
    tpu.vector_store %arg6[%c0_10, %c0_11], %12 {strides = array<i32>} : memref<8x2xf32, #tpu.memory_space<vmem>>, vector<8x2xf32>,
    return
  }
  func.func @transform_0(%arg0: i32) -> (i32, i32) {
    %c0_i32 = arith.constant 0 : i32
    %c0_i32_0 = arith.constant 0 : i32
    return %arg0, %c0_i32 : i32, i32
  }
  func.func @transform_1(%arg0: i32) -> (i32, i32) {
    %c0_i32 = arith.constant 0 : i32
    %c0_i32_0 = arith.constant 0 : i32
    %c0_i32_1 = arith.constant 0 : i32
    return %c0_i32, %c0_i32_0 : i32, i32
  }
  func.func @transform_2(%arg0: i32) -> (i32, i32) {
    %c0_i32 = arith.constant 0 : i32
    %c0_i32_0 = arith.constant 0 : i32
    %c0_i32_1 = arith.constant 0 : i32
    return %c0_i32, %c0_i32_0 : i32, i32
  }
  func.func @transform_3(%arg0: i32) -> (i32, i32) {
    %c0_i32 = arith.constant 0 : i32
    %c0_i32_0 = arith.constant 0 : i32
    %c0_i32_1 = arith.constant 0 : i32
    return %c0_i32, %c0_i32_0 : i32, i32
  }
  func.func @transform_4(%arg0: i32) -> (i32, i32) {
    %c0_i32 = arith.constant 0 : i32
    %c0_i32_0 = arith.constant 0 : i32
    %c0_i32_1 = arith.constant 0 : i32
    return %c0_i32, %c0_i32_0 : i32, i32
  }
  func.func @transform_5(%arg0: i32) -> (i32, i32) {
    %c0_i32 = arith.constant 0 : i32
    %c0_i32_0 = arith.constant 0 : i32
    return %arg0, %c0_i32 : i32, i32
  }
}

</mosaic_0001>

<bundles_post_ra>
// kernel: codet5_classifier_logits.1
= control target key start
LH: loop header
LB: loop body
LE: loop exit
PB: predicated region body
PF: predicated region fallthrough
CT: control target
= control target key end

     0   :  { %10 = vsyncpa [#allocation3], 0  ;;  %s4804_s0 = inlined_call_operand.vmem [shape: bf16[8,768], index: 0, kind: input, shape index: {}]   ;;  %s4805_s1 = inlined_call_operand.hbm [shape: bf16[768,768], index: 1, kind: input, shape index: {}]   ;;  %s4806_s2 = inlined_call_operand.vmem [shape: f32[1,768], index: 2, kind: input, shape index: {}]   ;;  %s4807_s3 = inlined_call_operand.vmem [shape: bf16[768,2], index: 3, kind: input, shape index: {}]   ;;  %s4808_s4 = inlined_call_operand.hbm [shape: f32[1,2], index: 4, kind: input, shape index: {}]   ;;  %s4809_s5 = inlined_call_operand.vmem [shape: f32[8,2], index: 5, kind: output, shape index: {}]  }
   0x1   :  { %s18_s20 = sshll.u32 %s4805_s1, 4  ;;  %s19_s20 = int_to_ptr.hbm [resolvable:$true] %s18_s20 }
   0x2   :  { %11 = vsyncpa [#allocation5], 0  ;;  %s4520_s21 = smov [#allocation2]   ;;  %s36_s25 = sshll.u32 %s4808_s4, 4  ;;  %s37_s25 = int_to_ptr.hbm [resolvable:$true] %s36_s25 }
   0x3   :  { %s20_s22 = sshll.u32 %s4520_s21, 4  ;;  %s4521_s26 = smov 384   ;;  %s21_s22 = int_to_ptr.vmem [resolvable:$true] %s20_s22 }
   0x4   :  { %s4522_s27 = smov 24   ;;  %s4523_s28 = smov [#allocation4]  }
   0x5   :  { %26 = dma.hbm_to_vmem [thread:$0]  %s19_s20, 36864, %s21_s22, [#allocation3], %s4521_s26, %s4521_s26, %s4522_s27  }
   0x6   :  { %s38_s29 = sshll.u32 %s4523_s28, 4  ;;  %s39_s29 = int_to_ptr.vmem [resolvable:$true] %s38_s29 }
   0x7   :  { %41 = dma.hbm_to_vmem [thread:$0]  %s37_s25, 16, %s39_s29, [#allocation5]  }
   0x8   :  { %4516 = dma.done.wait [#allocation3], 36864  }
   0x9   :  { %4517 = vsyncadd [#allocation3], 4294930432 }
   0xa   :  { %4518 = dma.done.wait [#allocation5], 16  }
   0xb   :  { %4519 = vsyncadd [#allocation5], 4294967280  ;;  %v2940_v0 = vld [vmem:[#allocation2 + $0x150] sm:$0xf]  ;;  %v4159_v1 = vld [vmem:[#allocation2 + $0x164] sm:$0xf0] }
   0xc   :  { %v3132_v2 = vld [vmem:[#allocation2 + $0x2d0] sm:$0xf]  ;;  %v2941_v3 = vor.u32 %v4159_v1, %v2940_v0  ;;  %v4207_v4 = vld [vmem:[#allocation2 + $0x2e4] sm:$0xf0]  ;;  %v2916_v11 = vld [vmem:[#allocation2 + $0x120] sm:$0xf] }
   0xd   :  { %v3324_v5 = vld [vmem:[#allocation2 + $0x450] sm:$0xf]  ;;  %v4255_v6 = vld [vmem:[#allocation2 + $0x464] sm:$0xf0]  ;;  %v3133_v7 = vor.u32 %v4207_v4, %v3132_v2  ;;  %v4153_v13 = vld [vmem:[#allocation2 + $0x134] sm:$0xf0] }
   0xe   :  { %v3325_v8 = vor.u32 %v4255_v6, %v3324_v5  ;;  %v3516_v9 = vld [vmem:[#allocation2 + $0x5d0] sm:$0xf]  ;;  %v4303_v10 = vld [vmem:[#allocation2 + $0x5e4] sm:$0xf0]  ;;  %1816 = vmatpush.bf16.msra.mxu0 %v2941_v3  ;;  %v3108_v14 = vld [vmem:[#allocation2 + $0x2a0] sm:$0xf]  ;;  %v2917_v16 = vor.u32 %v4153_v13, %v2916_v11 }
   0xf   :  { %v3517_v12 = vor.u32 %v4303_v10, %v3516_v9  ;;  %v4201_v15 = vld [vmem:[#allocation2 + $0x2b4] sm:$0xf0]  ;;  %1829 = vmatpush.bf16.msra.mxu1 %v3133_v7  ;;  %v3300_v18 = vld [vmem:[#allocation2 + $0x420] sm:$0xf]  ;;  %v2892_v23 = vld [vmem:[#allocation2 + $0xf0] sm:$0xf] }
  0x10   :  { %1842 = vmatpush.bf16.msra.mxu2 %v3325_v8  ;;  %v3109_v17 = vor.u32 %v4201_v15, %v3108_v14  ;;  %v4249_v19 = vld [vmem:[#allocation2 + $0x434] sm:$0xf0]  ;;  %v3492_v20 = vld [vmem:[#allocation2 + $0x5a0] sm:$0xf]  ;;  %v4147_v24 = vld [vmem:[#allocation2 + $0x104] sm:$0xf0] }
  0x11   :  { %1855 = vmatpush.bf16.msra.mxu3 %v3517_v12  ;;  %v3301_v21 = vor.u32 %v4249_v19, %v3300_v18  ;;  %v4297_v22 = vld [vmem:[#allocation2 + $0x5b4] sm:$0xf0]  ;;  %v3084_v26 = vld [vmem:[#allocation2 + $0x270] sm:$0xf]  ;;  %v4195_v27 = vld [vmem:[#allocation2 + $0x284] sm:$0xf0]  ;;  %v2893_v29 = vor.u32 %v4147_v24, %v2892_v23 }
  0x12   :  { %v3493_v25 = vor.u32 %v4297_v22, %v3492_v20  ;;  %v3276_v28 = vld [vmem:[#allocation2 + $0x3f0] sm:$0xf]  ;;  %1817 = vmatpush.bf16.msra.mxu0 %v2917_v16  ;;  %v4243_v30 = vld [vmem:[#allocation2 + $0x404] sm:$0xf0]  ;;  %v3085_v33 = vor.u32 %v4195_v27, %v3084_v26  ;;  %v2868_v35 = vld [vmem:[#allocation2 + $0xc0] sm:$0xf] }
  0x13   :  { %v3468_v31 = vld [vmem:[#allocation2 + $0x570] sm:$0xf]  ;;  %v4291_v32 = vld [vmem:[#allocation2 + $0x584] sm:$0xf0]  ;;  %1830 = vmatpush.bf16.msra.mxu1 %v3109_v17  ;;  %v3277_v34 = vor.u32 %v4243_v30, %v3276_v28  ;;  %v4141_v36 = vld [vmem:[#allocation2 + $0xd4] sm:$0xf0] }
  0x14   :  { %1843 = vmatpush.bf16.msra.mxu2 %v3301_v21  ;;  %v3060_v37 = vld [vmem:[#allocation2 + $0x240] sm:$0xf]  ;;  %v3469_v38 = vor.u32 %v4291_v32, %v3468_v31  ;;  %v4189_v39 = vld [vmem:[#allocation2 + $0x254] sm:$0xf0]  ;;  %v2869_v44 = vor.u32 %v4141_v36, %v2868_v35  ;;  %v2844_v47 = vld [vmem:[#allocation2 + $0x90] sm:$0xf] }
  0x15   :  { %1856 = vmatpush.bf16.msra.mxu3 %v3493_v25  ;;  %v3252_v40 = vld [vmem:[#allocation2 + $0x3c0] sm:$0xf]  ;;  %v4237_v41 = vld [vmem:[#allocation2 + $0x3d4] sm:$0xf0]  ;;  %v3061_v45 = vor.u32 %v4189_v39, %v3060_v37  ;;  %v4135_v48 = vld [vmem:[#allocation2 + $0xa4] sm:$0xf0] }
  0x16   :  { %v3444_v42 = vld [vmem:[#allocation2 + $0x540] sm:$0xf]  ;;  %v4285_v43 = vld [vmem:[#allocation2 + $0x554] sm:$0xf0]  ;;  %1818 = vmatpush.bf16.msra.mxu0 %v2893_v29  ;;  %v3253_v46 = vor.u32 %v4237_v41, %v3252_v40  ;;  %v3036_v49 = vld [vmem:[#allocation2 + $0x210] sm:$0xf]  ;;  %v2845_v56 = vor.u32 %v4135_v48, %v2844_v47 }
  0x17   :  { %1831 = vmatpush.bf16.msra.mxu1 %v3085_v33  ;;  %v3445_v50 = vor.u32 %v4285_v43, %v3444_v42  ;;  %v4183_v51 = vld [vmem:[#allocation2 + $0x224] sm:$0xf0]  ;;  %v3228_v52 = vld [vmem:[#allocation2 + $0x390] sm:$0xf]  ;;  %v2820_v59 = vld [vmem:[#allocation2 + $0x60] sm:$0xf] }
  0x18   :  { %1844 = vmatpush.bf16.msra.mxu2 %v3277_v34  ;;  %v4231_v53 = vld [vmem:[#allocation2 + $0x3a4] sm:$0xf0]  ;;  %v3420_v54 = vld [vmem:[#allocation2 + $0x510] sm:$0xf]  ;;  %v3037_v57 = vor.u32 %v4183_v51, %v3036_v49  ;;  %v4129_v60 = vld [vmem:[#allocation2 + $0x74] sm:$0xf0] }
  0x19   :  { %1857 = vmatpush.bf16.msra.mxu3 %v3469_v38  ;;  %v4279_v55 = vld [vmem:[#allocation2 + $0x524] sm:$0xf0]  ;;  %v3229_v58 = vor.u32 %v4231_v53, %v3228_v52  ;;  %v3012_v61 = vld [vmem:[#allocation2 + $0x1e0] sm:$0xf]  ;;  %v4177_v63 = vld [vmem:[#allocation2 + $0x1f4] sm:$0xf0]  ;;  %v2821_v4 = vor.u32 %v4129_v60, %v2820_v59 }
  0x1a   :  { %1819 = vmatpush.bf16.msra.mxu0 %v2869_v44  ;;  %v3421_v62 = vor.u32 %v4279_v55, %v3420_v54  ;;  %v3204_v0 = vld [vmem:[#allocation2 + $0x360] sm:$0xf]  ;;  %v4225_v1 = vld [vmem:[#allocation2 + $0x374] sm:$0xf0]  ;;  %v3013_v5 = vor.u32 %v4177_v63, %v3012_v61  ;;  %v2796_v7 = vld [vmem:[#allocation2 + $0x30] sm:$0xf] }
  0x1b   :  { %1832 = vmatpush.bf16.msra.mxu1 %v3061_v45  ;;  %v3396_v2 = vld [vmem:[#allocation2 + $0x4e0] sm:$0xf]  ;;  %v4273_v3 = vld [vmem:[#allocation2 + $0x4f4] sm:$0xf0]  ;;  %v3205_v6 = vor.u32 %v4225_v1, %v3204_v0  ;;  %v4123_v8 = vld [vmem:[#allocation2 + $0x44] sm:$0xf0] }
  0x1c   :  { %1845 = vmatpush.bf16.msra.mxu2 %v3253_v46  ;;  %v2988_v9 = vld [vmem:[#allocation2 + $0x1b0] sm:$0xf]  ;;  %v3397_v10 = vor.u32 %v4273_v3, %v3396_v2  ;;  %v4171_v11 = vld [vmem:[#allocation2 + $0x1c4] sm:$0xf0]  ;;  %v2797_v16 = vor.u32 %v4123_v8, %v2796_v7  ;;  %v2772_v17 = vld [vmem:[#allocation2] sm:$0xf] }
  0x1d   :  { %1858 = vmatpush.bf16.msra.mxu3 %v3445_v50  ;;  %v3180_v12 = vld [vmem:[#allocation2 + $0x330] sm:$0xf]  ;;  %v4219_v13 = vld [vmem:[#allocation2 + $0x344] sm:$0xf0]  ;;  %v4117_v18 = vld [vmem:[#allocation2 + $0x14] sm:$0xf0]  ;;  %v2989_v19 = vor.u32 %v4171_v11, %v2988_v9 }
  0x1e   :  { %1820 = vmatpush.bf16.msra.mxu0 %v2845_v56  ;;  %v3372_v14 = vld [vmem:[#allocation2 + $0x4b0] sm:$0xf]  ;;  %v4267_v15 = vld [vmem:[#allocation2 + $0x4c4] sm:$0xf0]  ;;  %v3181_v20 = vor.u32 %v4219_v13, %v3180_v12  ;;  %v2964_v21 = vld [vmem:[#allocation2 + $0x180] sm:$0xf]  ;;  %v2773_v31 = vor.u32 %v4117_v18, %v2772_v17 }
  0x1f   :  { %1833 = vmatpush.bf16.msra.mxu1 %v3037_v57  ;;  %v4165_v22 = vld [vmem:[#allocation2 + $0x194] sm:$0xf0]  ;;  %v3156_v23 = vld [vmem:[#allocation2 + $0x300] sm:$0xf]  ;;  %v3373_v24 = vor.u32 %v4267_v15, %v3372_v14  ;;  %v3708_v28 = vld [vmem:[#allocation2 + $0x750] sm:$0xf] }
  0x20   :  { %1846 = vmatpush.bf16.msra.mxu2 %v3229_v58  ;;  %v4213_v25 = vld [vmem:[#allocation2 + $0x314] sm:$0xf0]  ;;  %v3348_v26 = vld [vmem:[#allocation2 + $0x480] sm:$0xf]  ;;  %v4351_v29 = vld [vmem:[#allocation2 + $0x764] sm:$0xf0]  ;;  %v2965_v35 = vor.u32 %v4165_v22, %v2964_v21 }
  0x21   :  { %1859 = vmatpush.bf16.msra.mxu3 %v3421_v62  ;;  %v4261_v27 = vld [vmem:[#allocation2 + $0x494] sm:$0xf0]  ;;  %v3900_v30 = vld [vmem:[#allocation2 + $0x8d0] sm:$0xf]  ;;  %v4399_v32 = vld [vmem:[#allocation2 + $0x8e4] sm:$0xf0]  ;;  %v3157_v36 = vor.u32 %v4213_v25, %v3156_v23  ;;  %v3709_v40 = vor.u32 %v4351_v29, %v3708_v28 }
  0x22   :  { %1821 = vmatpush.bf16.msra.mxu0 %v2821_v4  ;;  %v4156_v33 = vld [vmem:[#allocation2 + $0x154] sm:$0xf]  ;;  %v2942_v34 = vld [vmem:[#allocation2 + $0x168] sm:$0xf0]  ;;  %v3349_v39 = vor.u32 %v4261_v27, %v3348_v26  ;;  %v3901_v41 = vor.u32 %v4399_v32, %v3900_v30  ;;  %v3684_v43 = vld [vmem:[#allocation2 + $0x720] sm:$0xf] }
  0x23   :  { %1834 = vmatpush.bf16.msra.mxu1 %v3013_v5  ;;  %v4204_v37 = vld [vmem:[#allocation2 + $0x2d4] sm:$0xf]  ;;  %v3134_v38 = vld [vmem:[#allocation2 + $0x2e8] sm:$0xf0]  ;;  %v2945_v42 = vor.u32 %v4156_v33, %v2942_v34  ;;  %v4345_v44 = vld [vmem:[#allocation2 + $0x734] sm:$0xf0] }
  0x24   :  { %1847 = vmatpush.bf16.msra.mxu2 %v3205_v6  ;;  %v3876_v45 = vld [vmem:[#allocation2 + $0x8a0] sm:$0xf]  ;;  %v3137_v46 = vor.u32 %v4204_v37, %v3134_v38  ;;  %v4393_v47 = vld [vmem:[#allocation2 + $0x8b4] sm:$0xf0]  ;;  %v4150_v48 = vld [vmem:[#allocation2 + $0x124] sm:$0xf]  ;;  %v3685_v52 = vor.u32 %v4345_v44, %v3684_v43 }
  0x25   :  { %1860 = vmatpush.bf16.msra.mxu3 %v3397_v10  ;;  %v2918_v49 = vld [vmem:[#allocation2 + $0x138] sm:$0xf0]  ;;  %v4198_v50 = vld [vmem:[#allocation2 + $0x2a4] sm:$0xf]  ;;  %v3660_v53 = vld [vmem:[#allocation2 + $0x6f0] sm:$0xf]  ;;  %v3877_v54 = vor.u32 %v4393_v47, %v3876_v45 }
  0x26   :  { %1822 = vmatpush.bf16.msra.mxu0 %v2797_v16  ;;  %v3110_v51 = vld [vmem:[#allocation2 + $0x2b8] sm:$0xf0]  ;;  %v2921_v55 = vor.u32 %v4150_v48, %v2918_v49  ;;  %v4339_v56 = vld [vmem:[#allocation2 + $0x704] sm:$0xf0]  ;;  %v3852_v57 = vld [vmem:[#allocation2 + $0x870] sm:$0xf] }
  0x27   :  { %1835 = vmatpush.bf16.msra.mxu1 %v2989_v19  ;;  %v4387_v58 = vld [vmem:[#allocation2 + $0x884] sm:$0xf0]  ;;  %v3113_v59 = vor.u32 %v4198_v50, %v3110_v51  ;;  %v4144_v60 = vld [vmem:[#allocation2 + $0xf4] sm:$0xf]  ;;  %v2894_v61 = vld [vmem:[#allocation2 + $0x108] sm:$0xf0]  ;;  %v3661_v0 = vor.u32 %v4339_v56, %v3660_v53 }
  0x28   :  { %1848 = vmatpush.bf16.msra.mxu2 %v3181_v20  ;;  %v4192_v62 = vld [vmem:[#allocation2 + $0x274] sm:$0xf]  ;;  %v3086_v63 = vld [vmem:[#allocation2 + $0x288] sm:$0xf0]  ;;  %v3853_v1 = vor.u32 %v4387_v58, %v3852_v57  ;;  %v50_v3 = vld [vmem:[%s4804_s0] sm:$0xff]  ;;  %v2897_v4 = vor.u32 %v4144_v60, %v2894_v61  ;;  %vm2762_vm0 = vcmask 15360  }
  0x29   :  { %1861 = vmatpush.bf16.msra.mxu3 %v3373_v24  ;;  %v51_v2 = vld [vmem:[%s4804_s0 + $0x8] sm:$0xff]  ;;  %v3636_v5 = vld [vmem:[#allocation2 + $0x6c0] sm:$0xf]  ;;  %v4333_v6 = vld [vmem:[#allocation2 + $0x6d4] sm:$0xf0]  ;;  %v358_v9 = vunpack.c.l.b16 %v50_v3  ;;  %v3089_v11 = vor.u32 %v4192_v62, %v3086_v63  ;;  %v359_v15 = vunpack.c.h.b16 %v50_v3 }
  0x2a   :  { %1823 = vmatpush.bf16.msra.mxu0 %v2773_v31  ;;  %v3828_v7 = vld [vmem:[#allocation2 + $0x840] sm:$0xf]  ;;  %v360_v8 = vunpack.c.l.b16 %v51_v2  ;;  %v361_v10 = vunpack.c.h.b16 %v51_v2  ;;  %v4381_v12 = vld [vmem:[#allocation2 + $0x854] sm:$0xf0]  ;;  %v4138_v13 = vld [vmem:[#allocation2 + $0xc4] sm:$0xf]  ;;  %v3637_v21 = vor.u32 %v4333_v6, %v3636_v5 }
  0x2b   :  { %1836 = vmatpush.bf16.msra.mxu1 %v2965_v35  ;;  %v2870_v14 = vld [vmem:[#allocation2 + $0xd8] sm:$0xf0]  ;;  %v4186_v16 = vld [vmem:[#allocation2 + $0x244] sm:$0xf]  ;;  %v4568_v19 = vpack.c.b16 %v358_v9, %v358_v9  ;;  %v4572_v22 = vpack.c.b16 %v359_v15, %v359_v15  ;;  %v3829_v23 = vor.u32 %v4381_v12, %v3828_v7  ;;  %v3612_v25 = vld [vmem:[#allocation2 + $0x690] sm:$0xf] }
  0x2c   :  { %1849 = vmatpush.bf16.msra.mxu2 %v3157_v36  ;;  %v3062_v17 = vld [vmem:[#allocation2 + $0x258] sm:$0xf0]  ;;  %v4566_v18 = vpack.c.b16 %v360_v8, %v360_v8  ;;  %v4570_v20 = vpack.c.b16 %v361_v10, %v361_v10  ;;  %v2873_v24 = vor.u32 %v4138_v13, %v2870_v14  ;;  %v4327_v26 = vld [vmem:[#allocation2 + $0x6a4] sm:$0xf0]  ;;  %v3804_v27 = vld [vmem:[#allocation2 + $0x810] sm:$0xf] }
  0x2d   :  { %1862 = vmatpush.bf16.msra.mxu3 %v3349_v39  ;;  %v3065_v28 = vor.u32 %v4186_v16, %v3062_v17  ;;  %v4375_v29 = vld [vmem:[#allocation2 + $0x824] sm:$0xf0]  ;;  %v4132_v30 = vld [vmem:[#allocation2 + $0x94] sm:$0xf]  ;;  %v2846_v31 = vld [vmem:[#allocation2 + $0xa8] sm:$0xf0]  ;;  %1824 = vmatmul.bf16.vlgmr.msra.gmra.mxu0 %v4568_v19  ;;  %v3613_v34 = vor.u32 %v4327_v26, %v3612_v25 }
  0x2e   :  { %1868 = vmatpush.bf16.msrb.mxu0 %v3709_v40  ;;  %v4180_v32 = vld [vmem:[#allocation2 + $0x214] sm:$0xf]  ;;  %v3038_v33 = vld [vmem:[#allocation2 + $0x228] sm:$0xf0]  ;;  %1837 = vmatmul.bf16.vlgmr.msra.gmra.mxu1 %v4572_v22  ;;  %v3805_v35 = vor.u32 %v4375_v29, %v3804_v27  ;;  %v2849_v36 = vor.u32 %v4132_v30, %v2846_v31  ;;  %v3588_v37 = vld [vmem:[#allocation2 + $0x660] sm:$0xf] }
  0x2f   :  { %1881 = vmatpush.bf16.msrb.mxu1 %v3901_v41  ;;  %1850 = vmatmul.bf16.vlgmr.msra.gmra.mxu2 %v4566_v18  ;;  %v4321_v38 = vld [vmem:[#allocation2 + $0x674] sm:$0xf0]  ;;  %v3780_v39 = vld [vmem:[#allocation2 + $0x7e0] sm:$0xf]  ;;  %v3041_v40 = vor.u32 %v4180_v32, %v3038_v33  ;;  %v2822_v43 = vld [vmem:[#allocation2 + $0x78] sm:$0xf0] }
  0x30   :  { %1894 = vmatpush.bf16.msrb.mxu2 %v2945_v42  ;;  %1863 = vmatmul.bf16.vlgmr.msra.gmra.mxu3 %v4570_v20  ;;  %v4369_v41 = vld [vmem:[#allocation2 + $0x7f4] sm:$0xf0]  ;;  %v4126_v42 = vld [vmem:[#allocation2 + $0x64] sm:$0xf]  ;;  %v3014_v45 = vld [vmem:[#allocation2 + $0x1f8] sm:$0xf0] }
  0x31   :  { %1907 = vmatpush.bf16.msrb.mxu3 %v3137_v46  ;;  %v4174_v44 = vld [vmem:[#allocation2 + $0x1e4] sm:$0xf]  ;;  %v3589_v46 = vor.u32 %v4321_v38, %v3588_v37  ;;  %v3781_v47 = vor.u32 %v4369_v41, %v3780_v39  ;;  %v2825_v48 = vor.u32 %v4126_v42, %v2822_v43  ;;  %v3564_v49 = vld [vmem:[#allocation2 + $0x630] sm:$0xf]  ;;  %v4315_v50 = vld [vmem:[#allocation2 + $0x644] sm:$0xf0] }
  0x32   :  { %1869 = vmatpush.bf16.msrb.mxu0 %v3685_v52  ;;  %v3756_v51 = vld [vmem:[#allocation2 + $0x7b0] sm:$0xf]  ;;  %v3017_v52 = vor.u32 %v4174_v44, %v3014_v45  ;;  %v4363_v53 = vld [vmem:[#allocation2 + $0x7c4] sm:$0xf0]  ;;  %v4168_v56 = vld [vmem:[#allocation2 + $0x1b4] sm:$0xf]  ;;  %v3565_v58 = vor.u32 %v4315_v50, %v3564_v49 }
  0x33   :  { %1882 = vmatpush.bf16.msrb.mxu1 %v3877_v54  ;;  %v4120_v54 = vld [vmem:[#allocation2 + $0x34] sm:$0xf]  ;;  %v2990_v57 = vld [vmem:[#allocation2 + $0x1c8] sm:$0xf0]  ;;  %v4309_v60 = vld [vmem:[#allocation2 + $0x614] sm:$0xf0]  ;;  %v3757_v62 = vor.u32 %v4363_v53, %v3756_v51 }
  0x34   :  { %1895 = vmatpush.bf16.msrb.mxu2 %v2921_v55  ;;  %v2798_v55 = vld [vmem:[#allocation2 + $0x48] sm:$0xf0]  ;;  %v3732_v61 = vld [vmem:[#allocation2 + $0x780] sm:$0xf]  ;;  %v52_v2 = vld [vmem:[%s4804_s0 + $0x10] sm:$0xff]  ;;  %v2993_v3 = vor.u32 %v4168_v56, %v2990_v57 }
  0x35   :  { %1908 = vmatpush.bf16.msrb.mxu3 %v3113_v59  ;;  %v3540_v59 = vld [vmem:[#allocation2 + $0x600] sm:$0xf]  ;;  %v2801_v63 = vor.u32 %v4120_v54, %v2798_v55  ;;  %v4162_v5 = vld [vmem:[#allocation2 + $0x184] sm:$0xf]  ;;  %v2966_v6 = vld [vmem:[#allocation2 + $0x198] sm:$0xf0]  ;;  %v362_v14 = vunpack.c.l.b16 %v52_v2 }
  0x36   :  { %1870 = vmatpush.bf16.msrb.mxu0 %v3661_v0  ;;  %v4357_v0 = vld [vmem:[#allocation2 + $0x794] sm:$0xf0]  ;;  %v4252_v7 = vld [vmem:[#allocation2 + $0x454] sm:$0xf]  ;;  %v3326_v8 = vld [vmem:[#allocation2 + $0x468] sm:$0xf0]  ;;  %v3541_v10 = vor.u32 %v4309_v60, %v3540_v59 }
  0x37   :  { %1883 = vmatpush.bf16.msrb.mxu1 %v3853_v1  ;;  %v4114_v1 = vld [vmem:[#allocation2 + $0x4] sm:$0xf]  ;;  %v4300_v9 = vld [vmem:[#allocation2 + $0x5d4] sm:$0xf]  ;;  %v3710_v13 = vld [vmem:[#allocation2 + $0x768] sm:$0xf0]  ;;  %v3733_v15 = vor.u32 %v4357_v0, %v3732_v61  ;;  %v3329_v25 = vor.u32 %v4252_v7, %v3326_v8 }
  0x38   :  { %1896 = vmatpush.bf16.msrb.mxu2 %v2897_v4  ;;  %v2774_v4 = vld [vmem:[#allocation2 + $0x18] sm:$0xf0]  ;;  %v4348_v12 = vld [vmem:[#allocation2 + $0x754] sm:$0xf]  ;;  %v4294_v30 = vld [vmem:[#allocation2 + $0x5a4] sm:$0xf] }
  0x39   :  { %1909 = vmatpush.bf16.msrb.mxu3 %v3089_v11  ;;  %v3518_v11 = vld [vmem:[#allocation2 + $0x5e8] sm:$0xf0]  ;;  %v2777_v16 = vor.u32 %v4114_v1, %v2774_v4  ;;  %v4396_v17 = vld [vmem:[#allocation2 + $0x8d4] sm:$0xf]  ;;  %v3713_v27 = vor.u32 %v4348_v12, %v3710_v13  ;;  %v3302_v29 = vld [vmem:[#allocation2 + $0x438] sm:$0xf0] }
  0x3a   :  { %1871 = vmatpush.bf16.msrb.mxu0 %v3637_v21  ;;  %v3902_v21 = vld [vmem:[#allocation2 + $0x8e8] sm:$0xf0]  ;;  %v3521_v26 = vor.u32 %v4300_v9, %v3518_v11  ;;  %v3494_v32 = vld [vmem:[#allocation2 + $0x5b8] sm:$0xf0]  ;;  %v4342_v33 = vld [vmem:[#allocation2 + $0x724] sm:$0xf] }
  0x3b   :  { %1884 = vmatpush.bf16.msrb.mxu1 %v3829_v23  ;;  %v363_v23 = vunpack.c.h.b16 %v52_v2  ;;  %v3905_v31 = vor.u32 %v4396_v17, %v3902_v21  ;;  %v3878_v37 = vld [vmem:[#allocation2 + $0x8b8] sm:$0xf0]  ;;  %v4240_v42 = vld [vmem:[#allocation2 + $0x3f4] sm:$0xf]  ;;  %v3278_v43 = vld [vmem:[#allocation2 + $0x408] sm:$0xf0] }
  0x3c   :  { %1897 = vmatpush.bf16.msrb.mxu2 %v2873_v24  ;;  %v2969_v24 = vor.u32 %v4162_v5, %v2966_v6  ;;  %v4288_v44 = vld [vmem:[#allocation2 + $0x574] sm:$0xf]  ;;  %v3854_v50 = vld [vmem:[#allocation2 + $0x888] sm:$0xf0]  ;;  %v3281_v51 = vor.u32 %v4240_v42, %v3278_v43  ;;  %v4234_v54 = vld [vmem:[#allocation2 + $0x3c4] sm:$0xf] }
  0x3d   :  { %1910 = vmatpush.bf16.msrb.mxu3 %v3065_v28  ;;  %v4246_v28 = vld [vmem:[#allocation2 + $0x424] sm:$0xf]  ;;  %v4583_v38 = vpack.c.b16 %v363_v23, %v363_v23  ;;  %v4384_v49 = vld [vmem:[#allocation2 + $0x874] sm:$0xf]  ;;  %v3254_v55 = vld [vmem:[#allocation2 + $0x3d8] sm:$0xf0] }
  0x3e   :  { %1872 = vmatpush.bf16.msrb.mxu0 %v3613_v34  ;;  %v3686_v34 = vld [vmem:[#allocation2 + $0x738] sm:$0xf0]  ;;  %v3305_v39 = vor.u32 %v4246_v28, %v3302_v29  ;;  %v4282_v56 = vld [vmem:[#allocation2 + $0x544] sm:$0xf]  ;;  %v3857_v57 = vor.u32 %v4384_v49, %v3854_v50  ;;  %v4228_v2 = vld [vmem:[#allocation2 + $0x394] sm:$0xf] }
  0x3f   :  { %1885 = vmatpush.bf16.msrb.mxu1 %v3805_v35  ;;  %v4581_v35 = vpack.c.b16 %v362_v14, %v362_v14  ;;  %v3689_v41 = vor.u32 %v4342_v33, %v3686_v34  ;;  %v4330_v59 = vld [vmem:[#allocation2 + $0x6c4] sm:$0xf]  ;;  %v3638_v60 = vld [vmem:[#allocation2 + $0x6d8] sm:$0xf0]  ;;  %v4276_v4 = vld [vmem:[#allocation2 + $0x514] sm:$0xf] }
  0x40   :  { %1898 = vmatpush.bf16.msrb.mxu2 %v2849_v36  ;;  %v4390_v36 = vld [vmem:[#allocation2 + $0x8a4] sm:$0xf]  ;;  %v3641_v1 = vor.u32 %v4330_v59, %v3638_v60  ;;  %v3422_v6 = vld [vmem:[#allocation2 + $0x528] sm:$0xf0]  ;;  %v4324_v7 = vld [vmem:[#allocation2 + $0x694] sm:$0xf] }
  0x41   :  { %1911 = vmatpush.bf16.msrb.mxu3 %v3041_v40  ;;  %v3497_v40 = vor.u32 %v4294_v30, %v3494_v32  ;;  %v3881_v45 = vor.u32 %v4390_v36, %v3878_v37  ;;  %v4378_v61 = vld [vmem:[#allocation2 + $0x844] sm:$0xf]  ;;  %v3614_v8 = vld [vmem:[#allocation2 + $0x6a8] sm:$0xf0]  ;;  %v4372_v9 = vld [vmem:[#allocation2 + $0x814] sm:$0xf]  ;;  %v3425_v12 = vor.u32 %v4276_v4, %v3422_v6 }
  0x42   :  { %1873 = vmatpush.bf16.msrb.mxu0 %v3589_v46  ;;  %v3470_v46 = vld [vmem:[#allocation2 + $0x588] sm:$0xf0]  ;;  %v3617_v13 = vor.u32 %v4324_v7, %v3614_v8  ;;  %v4222_v14 = vld [vmem:[#allocation2 + $0x364] sm:$0xf]  ;;  %v3398_v21 = vld [vmem:[#allocation2 + $0x4f8] sm:$0xf0] }
  0x43   :  { %1886 = vmatpush.bf16.msrb.mxu1 %v3781_v47  ;;  %v4336_v47 = vld [vmem:[#allocation2 + $0x6f4] sm:$0xf]  ;;  %v4318_v23 = vld [vmem:[#allocation2 + $0x664] sm:$0xf]  ;;  %v3374_v34 = vld [vmem:[#allocation2 + $0x4c8] sm:$0xf0] }
  0x44   :  { %1899 = vmatpush.bf16.msrb.mxu2 %v2825_v48  ;;  %v3662_v48 = vld [vmem:[#allocation2 + $0x708] sm:$0xf0]  ;;  %v4216_v30 = vld [vmem:[#allocation2 + $0x334] sm:$0xf]  ;;  %v4210_v42 = vld [vmem:[#allocation2 + $0x304] sm:$0xf] }
  0x45   :  { %1912 = vmatpush.bf16.msrb.mxu3 %v3017_v52  ;;  %v3473_v52 = vor.u32 %v4288_v44, %v3470_v46  ;;  %v3665_v53 = vor.u32 %v4336_v47, %v3662_v48  ;;  %v4264_v32 = vld [vmem:[#allocation2 + $0x4b4] sm:$0xf]  ;;  %v3566_v37 = vld [vmem:[#allocation2 + $0x648] sm:$0xf0]  ;;  %v3158_v43 = vld [vmem:[#allocation2 + $0x318] sm:$0xf0] }
  0x46   :  { %1874 = vmatpush.bf16.msrb.mxu0 %v3565_v58  ;;  %v3446_v58 = vld [vmem:[#allocation2 + $0x558] sm:$0xf0]  ;;  %v4312_v36 = vld [vmem:[#allocation2 + $0x634] sm:$0xf]  ;;  %v3377_v44 = vor.u32 %v4264_v32, %v3374_v34  ;;  %v4258_v46 = vld [vmem:[#allocation2 + $0x484] sm:$0xf] }
  0x47   :  { %1887 = vmatpush.bf16.msrb.mxu1 %v3757_v62  ;;  %v3830_v62 = vld [vmem:[#allocation2 + $0x858] sm:$0xf0]  ;;  %v3449_v0 = vor.u32 %v4282_v56, %v3446_v58  ;;  %v4306_v48 = vld [vmem:[#allocation2 + $0x604] sm:$0xf]  ;;  %v3161_v56 = vor.u32 %v4210_v42, %v3158_v43  ;;  %v3332_v58 = vld [vmem:[#allocation2 + $0x458] sm:$0xf] }
  0x48   :  { %1900 = vmatpush.bf16.msrb.mxu2 %v2801_v63  ;;  %v3257_v63 = vor.u32 %v4234_v54, %v3254_v55  ;;  %v3833_v5 = vor.u32 %v4378_v61, %v3830_v62  ;;  %v3350_v47 = vld [vmem:[#allocation2 + $0x498] sm:$0xf0]  ;;  %v4160_v54 = vld [vmem:[#allocation2 + $0x16c] sm:$0xf0]  ;;  %v3140_v55 = vld [vmem:[#allocation2 + $0x2d8] sm:$0xf] }
  0x49   :  { %1913 = vmatpush.bf16.msrb.mxu3 %v2993_v3  ;;  %v3230_v3 = vld [vmem:[#allocation2 + $0x3a8] sm:$0xf0]  ;;  %v3542_v50 = vld [vmem:[#allocation2 + $0x618] sm:$0xf0]  ;;  %v4256_v59 = vld [vmem:[#allocation2 + $0x46c] sm:$0xf0]  ;;  %v3353_v60 = vor.u32 %v4258_v46, %v3350_v47 }
  0x4a   :  { %1875 = vmatpush.bf16.msrb.mxu0 %v3541_v10  ;;  %v3806_v10 = vld [vmem:[#allocation2 + $0x828] sm:$0xf0]  ;;  %v3233_v11 = vor.u32 %v4228_v2, %v3230_v3  ;;  %v3545_v61 = vor.u32 %v4306_v48, %v3542_v50  ;;  %v3524_v62 = vld [vmem:[#allocation2 + $0x5d8] sm:$0xf]  ;;  %v3333_v3 = vor.u32 %v4256_v59, %v3332_v58  ;;  %v2924_v4 = vld [vmem:[#allocation2 + $0x128] sm:$0xf] }
  0x4b   :  { %1888 = vmatpush.bf16.msrb.mxu1 %v3733_v15  ;;  %v3206_v15 = vld [vmem:[#allocation2 + $0x378] sm:$0xf0]  ;;  %v3809_v17 = vor.u32 %v4372_v9, %v3806_v10  ;;  %v3116_v6 = vld [vmem:[#allocation2 + $0x2a8] sm:$0xf]  ;;  %v4202_v8 = vld [vmem:[#allocation2 + $0x2bc] sm:$0xf0] }
  0x4c   :  { %1901 = vmatpush.bf16.msrb.mxu2 %v2777_v16  ;;  %v4270_v16 = vld [vmem:[#allocation2 + $0x4e4] sm:$0xf]  ;;  %v3308_v9 = vld [vmem:[#allocation2 + $0x428] sm:$0xf]  ;;  %v4250_v10 = vld [vmem:[#allocation2 + $0x43c] sm:$0xf0] }
  0x4d   :  { %1914 = vmatpush.bf16.msrb.mxu3 %v2969_v24  ;;  %1876 = vmatmul.bf16.vlgmr.msrb.gmra.mxu0 %v4581_v35  ;;  %v3590_v24 = vld [vmem:[#allocation2 + $0x678] sm:$0xf0]  ;;  %v3401_v28 = vor.u32 %v4270_v16, %v3398_v21  ;;  %v2900_v16 = vld [vmem:[#allocation2 + $0xf8] sm:$0xf]  ;;  %v2876_v32 = vld [vmem:[#allocation2 + $0xc8] sm:$0xf] }
  0x4e   :  { %1920 = vmatpush.bf16.msra.mxu0 %v3329_v25  ;;  %1889 = vmatmul.bf16.vlgmr.msrb.gmra.mxu1 %v4583_v38  ;;  %v4366_v25 = vld [vmem:[#allocation2 + $0x7e4] sm:$0xf]  ;;  %v3593_v29 = vor.u32 %v4318_v23, %v3590_v24  ;;  %v3092_v21 = vld [vmem:[#allocation2 + $0x278] sm:$0xf]  ;;  %v4196_v24 = vld [vmem:[#allocation2 + $0x28c] sm:$0xf0] }
  0x4f   :  { %1933 = vmatpush.bf16.msra.mxu1 %v3521_v26  ;;  %1902 = vmatmul.bf16.vlgmr.msrb.gmra.mxu2 %v4568_v19  ;;  %v3782_v26 = vld [vmem:[#allocation2 + $0x7f8] sm:$0xf0]  ;;  %v3068_v34 = vld [vmem:[#allocation2 + $0x248] sm:$0xf]  ;;  %v4286_v42 = vld [vmem:[#allocation2 + $0x55c] sm:$0xf0] }
  0x50   :  { %1946 = vmatpush.bf16.msra.mxu2 %v3713_v27  ;;  %1915 = vmatmul.bf16.vlgmr.msrb.gmra.mxu3 %v4572_v22  ;;  %v3209_v27 = vor.u32 %v4222_v14, %v3206_v15  ;;  %v3785_v33 = vor.u32 %v4366_v25, %v3782_v26  ;;  %v3117_v14 = vor.u32 %v4202_v8, %v3116_v6  ;;  %v3284_v25 = vld [vmem:[#allocation2 + $0x3f8] sm:$0xf]  ;;  %v4244_v26 = vld [vmem:[#allocation2 + $0x40c] sm:$0xf0]  ;;  %v2828_v58 = vld [vmem:[#allocation2 + $0x68] sm:$0xf] }
  0x51   :  { %1959 = vmatpush.bf16.msra.mxu3 %v3905_v31  ;;  %v3182_v31 = vld [vmem:[#allocation2 + $0x348] sm:$0xf0]  ;;  %v3309_v15 = vor.u32 %v4250_v10, %v3308_v9  ;;  %v2852_v46 = vld [vmem:[#allocation2 + $0x98] sm:$0xf]  ;;  %v4136_v47 = vld [vmem:[#allocation2 + $0xac] sm:$0xf0] }
  0x52   :  { %1921 = vmatpush.bf16.msra.mxu0 %v3305_v39  ;;  %v4360_v39 = vld [vmem:[#allocation2 + $0x7b4] sm:$0xf]  ;;  %v3044_v48 = vld [vmem:[#allocation2 + $0x218] sm:$0xf]  ;;  %v4184_v50 = vld [vmem:[#allocation2 + $0x22c] sm:$0xf0] }
  0x53   :  { %1934 = vmatpush.bf16.msra.mxu1 %v3497_v40  ;;  %v3758_v40 = vld [vmem:[#allocation2 + $0x7c8] sm:$0xf0]  ;;  %v4130_v59 = vld [vmem:[#allocation2 + $0x7c] sm:$0xf0]  ;;  %v2804_v6 = vld [vmem:[#allocation2 + $0x38] sm:$0xf] }
  0x54   :  { %1947 = vmatpush.bf16.msra.mxu2 %v3689_v41  ;;  %v3185_v41 = vor.u32 %v4216_v30, %v3182_v31  ;;  %v3761_v49 = vor.u32 %v4360_v39, %v3758_v40  ;;  %v3093_v30 = vor.u32 %v4196_v24, %v3092_v21  ;;  %v3285_v31 = vor.u32 %v4244_v26, %v3284_v25  ;;  %v3260_v39 = vld [vmem:[#allocation2 + $0x3c8] sm:$0xf]  ;;  %v4238_v40 = vld [vmem:[#allocation2 + $0x3dc] sm:$0xf0]  ;;  %v2996_v8 = vld [vmem:[#allocation2 + $0x1b8] sm:$0xf] }
  0x55   :  { %1960 = vmatpush.bf16.msra.mxu3 %v3881_v45  ;;  %v3569_v45 = vor.u32 %v4312_v36, %v3566_v37  ;;  %v4190_v37 = vld [vmem:[#allocation2 + $0x25c] sm:$0xf0]  ;;  %v4172_v10 = vld [vmem:[#allocation2 + $0x1cc] sm:$0xf0]  ;;  %v2972_v24 = vld [vmem:[#allocation2 + $0x188] sm:$0xf] }
  0x56   :  { %1922 = vmatpush.bf16.msra.mxu0 %v3281_v51  ;;  %v4354_v51 = vld [vmem:[#allocation2 + $0x784] sm:$0xf]  ;;  %v2997_v21 = vor.u32 %v4172_v10, %v2996_v8  ;;  %v4166_v25 = vld [vmem:[#allocation2 + $0x19c] sm:$0xf0]  ;;  %v3164_v26 = vld [vmem:[#allocation2 + $0x308] sm:$0xf] }
  0x57   :  { %1935 = vmatpush.bf16.msra.mxu1 %v3473_v52  ;;  %v3734_v52 = vld [vmem:[#allocation2 + $0x798] sm:$0xf0]  ;;  %v3644_v8 = vld [vmem:[#allocation2 + $0x6c8] sm:$0xf] }
  0x58   :  { %1948 = vmatpush.bf16.msra.mxu2 %v3665_v53  ;;  %v2948_v53 = vld [vmem:[#allocation2 + $0x158] sm:$0xf]  ;;  %v3836_v10 = vld [vmem:[#allocation2 + $0x848] sm:$0xf] }
  0x59   :  { %1961 = vmatpush.bf16.msra.mxu3 %v3857_v57  ;;  %v4208_v57 = vld [vmem:[#allocation2 + $0x2ec] sm:$0xf0] }
  0x5a   :  { %1923 = vmatpush.bf16.msra.mxu0 %v3257_v63  ;;  %v4304_v63 = vld [vmem:[#allocation2 + $0x5ec] sm:$0xf0]  ;;  %v3141_v2 = vor.u32 %v4208_v57, %v3140_v55  ;;  %v2853_v55 = vor.u32 %v4136_v47, %v2852_v46 }
  0x5b   :  { %1936 = vmatpush.bf16.msra.mxu1 %v3449_v0  ;;  %v3737_v0 = vor.u32 %v4354_v51, %v3734_v52  ;;  %v3525_v7 = vor.u32 %v4304_v63, %v3524_v62  ;;  %v3236_v51 = vld [vmem:[#allocation2 + $0x398] sm:$0xf]  ;;  %v4232_v52 = vld [vmem:[#allocation2 + $0x3ac] sm:$0xf0]  ;;  %v4178_v62 = vld [vmem:[#allocation2 + $0x1fc] sm:$0xf0] }
  0x5c   :  { %1949 = vmatpush.bf16.msra.mxu2 %v3641_v1  ;;  %v2949_v1 = vor.u32 %v4160_v54, %v2948_v53  ;;  %v3428_v53 = vld [vmem:[#allocation2 + $0x518] sm:$0xf]  ;;  %v4280_v54 = vld [vmem:[#allocation2 + $0x52c] sm:$0xf0]  ;;  %v3237_v57 = vor.u32 %v4232_v52, %v3236_v51  ;;  %v3212_v63 = vld [vmem:[#allocation2 + $0x368] sm:$0xf] }
  0x5d   :  { %1962 = vmatpush.bf16.msra.mxu3 %v3833_v5  ;;  %v4154_v5 = vld [vmem:[#allocation2 + $0x13c] sm:$0xf0] }
  0x5e   :  { %1924 = vmatpush.bf16.msra.mxu0 %v3233_v11  ;;  %v3500_v11 = vld [vmem:[#allocation2 + $0x5a8] sm:$0xf]  ;;  %v4394_v52 = vld [vmem:[#allocation2 + $0x8bc] sm:$0xf0] }
  0x5f   :  { %1937 = vmatpush.bf16.msra.mxu1 %v3425_v12  ;;  %v4298_v12 = vld [vmem:[#allocation2 + $0x5bc] sm:$0xf0] }
  0x60   :  { %1950 = vmatpush.bf16.msra.mxu2 %v3617_v13  ;;  %v2925_v13 = vor.u32 %v4154_v5, %v2924_v4  ;;  %v3501_v23 = vor.u32 %v4298_v12, %v3500_v11  ;;  %v3188_v11 = vld [vmem:[#allocation2 + $0x338] sm:$0xf]  ;;  %v4220_v12 = vld [vmem:[#allocation2 + $0x34c] sm:$0xf0] }
  0x61   :  { %1963 = vmatpush.bf16.msra.mxu3 %v3809_v17  ;;  %v4148_v17 = vld [vmem:[#allocation2 + $0x10c] sm:$0xf0] }
  0x62   :  { %1925 = vmatpush.bf16.msra.mxu0 %v3209_v27  ;;  %v3476_v27 = vld [vmem:[#allocation2 + $0x578] sm:$0xf] }
  0x63   :  { %1938 = vmatpush.bf16.msra.mxu1 %v3401_v28  ;;  %v4292_v28 = vld [vmem:[#allocation2 + $0x58c] sm:$0xf0] }
  0x64   :  { %1951 = vmatpush.bf16.msra.mxu2 %v3593_v29  ;;  %v2901_v29 = vor.u32 %v4148_v17, %v2900_v16  ;;  %v3477_v36 = vor.u32 %v4292_v28, %v3476_v27  ;;  %v2780_v16 = vld [vmem:[#allocation2 + $0x8] sm:$0xf]  ;;  %v4118_v17 = vld [vmem:[#allocation2 + $0x1c] sm:$0xf0] }
  0x65   :  { %1964 = vmatpush.bf16.msra.mxu3 %v3785_v33  ;;  %v4142_v33 = vld [vmem:[#allocation2 + $0xdc] sm:$0xf0] }
  0x66   :  { %1926 = vmatpush.bf16.msra.mxu0 %v3185_v41  ;;  %v3452_v41 = vld [vmem:[#allocation2 + $0x548] sm:$0xf]  ;;  %v2877_v43 = vor.u32 %v4142_v33, %v2876_v32  ;;  %v4214_v28 = vld [vmem:[#allocation2 + $0x31c] sm:$0xf0]  ;;  %v4352_v32 = vld [vmem:[#allocation2 + $0x76c] sm:$0xf0] }
  0x67   :  { %1939 = vmatpush.bf16.msra.mxu1 %v3377_v44  ;;  %v3069_v44 = vor.u32 %v4190_v37, %v3068_v34  ;;  %v3908_v33 = vld [vmem:[#allocation2 + $0x8d8] sm:$0xf]  ;;  %v2781_v34 = vor.u32 %v4118_v17, %v2780_v16  ;;  %v4157_v37 = vld [vmem:[#allocation2 + $0x15c] sm:$0xf]  ;;  %v3070_v16 = vld [vmem:[#allocation2 + $0x260] sm:$0xf0] }
  0x68   :  { %1952 = vmatpush.bf16.msra.mxu2 %v3569_v45  ;;  %v3261_v45 = vor.u32 %v4238_v40, %v3260_v39  ;;  %v2950_v39 = vld [vmem:[#allocation2 + $0x170] sm:$0xf0]  ;;  %v2973_v40 = vor.u32 %v4166_v25, %v2972_v24  ;;  %v3620_v24 = vld [vmem:[#allocation2 + $0x698] sm:$0xf]  ;;  %v4328_v25 = vld [vmem:[#allocation2 + $0x6ac] sm:$0xf0] }
  0x69   :  { %1965 = vmatpush.bf16.msra.mxu3 %v3761_v49  ;;  %v3453_v49 = vor.u32 %v4286_v42, %v3452_v41  ;;  %v3165_v41 = vor.u32 %v4214_v28, %v3164_v26  ;;  %v4205_v42 = vld [vmem:[#allocation2 + $0x2dc] sm:$0xf]  ;;  %v2953_v47 = vor.u32 %v4157_v37, %v2950_v39  ;;  %v3812_v26 = vld [vmem:[#allocation2 + $0x818] sm:$0xf]  ;;  %v4376_v28 = vld [vmem:[#allocation2 + $0x82c] sm:$0xf0] }
  0x6a   :  { %1927 = vmatpush.bf16.msra.mxu0 %v3161_v56  ;;  %v3045_v56 = vor.u32 %v4184_v50, %v3044_v48  ;;  %v3692_v48 = vld [vmem:[#allocation2 + $0x728] sm:$0xf]  ;;  %v4322_v39 = vld [vmem:[#allocation2 + $0x67c] sm:$0xf0] }
  0x6b   :  { %1940 = vmatpush.bf16.msra.mxu1 %v3353_v60  ;;  %v3020_v60 = vld [vmem:[#allocation2 + $0x1e8] sm:$0xf] }
  0x6c   :  { %1953 = vmatpush.bf16.msra.mxu2 %v3545_v61  ;;  %v3429_v61 = vor.u32 %v4280_v54, %v3428_v53  ;;  %v3021_v4 = vor.u32 %v4178_v62, %v3020_v60  ;;  %v3884_v50 = vld [vmem:[#allocation2 + $0x8a8] sm:$0xf]  ;;  %v4151_v53 = vld [vmem:[#allocation2 + $0x12c] sm:$0xf]  ;;  %v2926_v54 = vld [vmem:[#allocation2 + $0x140] sm:$0xf0] }
  0x6d   :  { %1966 = vmatpush.bf16.msra.mxu3 %v3737_v0  ;;  %1928 = vmatmul.bf16.vlgmr.msra.gmra.mxu0 %v4566_v18  ;;  %v4226_v0 = vld [vmem:[#allocation2 + $0x37c] sm:$0xf0]  ;;  %v3668_v60 = vld [vmem:[#allocation2 + $0x6f8] sm:$0xf]  ;;  %v3596_v37 = vld [vmem:[#allocation2 + $0x668] sm:$0xf] }
  0x6e   :  { %1972 = vmatpush.bf16.msrb.mxu0 %v2949_v1  ;;  %1941 = vmatmul.bf16.vlgmr.msra.gmra.mxu1 %v4570_v20  ;;  %v3404_v1 = vld [vmem:[#allocation2 + $0x4e8] sm:$0xf]  ;;  %v3213_v5 = vor.u32 %v4226_v0, %v3212_v63  ;;  %v3860_v62 = vld [vmem:[#allocation2 + $0x878] sm:$0xf]  ;;  %v4388_v0 = vld [vmem:[#allocation2 + $0x88c] sm:$0xf0] }
  0x6f   :  { %1985 = vmatpush.bf16.msrb.mxu1 %v3141_v2  ;;  %1954 = vmatmul.bf16.vlgmr.msra.gmra.mxu2 %v4581_v35  ;;  %v4274_v2 = vld [vmem:[#allocation2 + $0x4fc] sm:$0xf0] }
  0x70   :  { %1998 = vmatpush.bf16.msrb.mxu2 %v3333_v3  ;;  %1967 = vmatmul.bf16.vlgmr.msra.gmra.mxu3 %v4583_v38  ;;  %v2829_v3 = vor.u32 %v4130_v59, %v2828_v58  ;;  %v3405_v9 = vor.u32 %v4274_v2, %v3404_v1  ;;  %v3885_v58 = vor.u32 %v4394_v52, %v3884_v50  ;;  %v4145_v1 = vld [vmem:[#allocation2 + $0xfc] sm:$0xf]  ;;  %v2902_v2 = vld [vmem:[#allocation2 + $0x110] sm:$0xf0]  ;;  %v3572_v50 = vld [vmem:[#allocation2 + $0x638] sm:$0xf] }
  0x71   :  { %2011 = vmatpush.bf16.msrb.mxu3 %v3525_v7  ;;  %v4124_v7 = vld [vmem:[#allocation2 + $0x4c] sm:$0xf0]  ;;  %v2929_v59 = vor.u32 %v4151_v53, %v2926_v54  ;;  %v3764_v52 = vld [vmem:[#allocation2 + $0x7b8] sm:$0xf] }
  0x72   :  { %1973 = vmatpush.bf16.msrb.mxu0 %v2925_v13  ;;  %v3380_v13 = vld [vmem:[#allocation2 + $0x4b8] sm:$0xf]  ;;  %v4364_v54 = vld [vmem:[#allocation2 + $0x7cc] sm:$0xf0] }
  0x73   :  { %1986 = vmatpush.bf16.msrb.mxu1 %v3117_v14  ;;  %v4268_v14 = vld [vmem:[#allocation2 + $0x4cc] sm:$0xf0] }
  0x74   :  { %1999 = vmatpush.bf16.msrb.mxu2 %v3309_v15  ;;  %v2805_v15 = vor.u32 %v4124_v7, %v2804_v6  ;;  %v3381_v27 = vor.u32 %v4268_v14, %v3380_v13  ;;  %v3861_v6 = vor.u32 %v4388_v0, %v3860_v62  ;;  %v2905_v7 = vor.u32 %v4145_v1, %v2902_v2  ;;  %v4139_v13 = vld [vmem:[#allocation2 + $0xcc] sm:$0xf]  ;;  %v2878_v14 = vld [vmem:[#allocation2 + $0xe0] sm:$0xf0]  ;;  %v3740_v0 = vld [vmem:[#allocation2 + $0x788] sm:$0xf] }
  0x75   :  { %2012 = vmatpush.bf16.msrb.mxu3 %v3501_v23  ;;  %v3189_v23 = vor.u32 %v4220_v12, %v3188_v11  ;;  %v4382_v12 = vld [vmem:[#allocation2 + $0x85c] sm:$0xf0]  ;;  %v3765_v62 = vor.u32 %v4364_v54, %v3764_v52  ;;  %v4115_v2 = vld [vmem:[#allocation2 + $0xc] sm:$0xf] }
  0x76   :  { %1974 = vmatpush.bf16.msrb.mxu0 %v2901_v29  ;;  %v3356_v29 = vld [vmem:[#allocation2 + $0x488] sm:$0xf]  ;;  %v4358_v1 = vld [vmem:[#allocation2 + $0x79c] sm:$0xf0]  ;;  %v4235_v52 = vld [vmem:[#allocation2 + $0x3cc] sm:$0xf] }
  0x77   :  { %1987 = vmatpush.bf16.msrb.mxu1 %v3093_v30  ;;  %v4262_v30 = vld [vmem:[#allocation2 + $0x49c] sm:$0xf0]  ;;  %v4283_v54 = vld [vmem:[#allocation2 + $0x54c] sm:$0xf] }
  0x78   :  { %2000 = vmatpush.bf16.msrb.mxu2 %v3285_v31  ;;  %v3716_v31 = vld [vmem:[#allocation2 + $0x758] sm:$0xf] }
  0x79   :  { %2013 = vmatpush.bf16.msrb.mxu3 %v3477_v36  ;;  %v4400_v36 = vld [vmem:[#allocation2 + $0x8ec] sm:$0xf0] }
  0x7a   :  { %1975 = vmatpush.bf16.msrb.mxu0 %v2877_v43  ;;  %v3142_v43 = vld [vmem:[#allocation2 + $0x2f0] sm:$0xf0]  ;;  %v3909_v46 = vor.u32 %v4400_v36, %v3908_v33  ;;  %v3621_v33 = vor.u32 %v4328_v25, %v3620_v24 }
  0x7b   :  { %1988 = vmatpush.bf16.msrb.mxu1 %v3069_v44  ;;  %v3357_v44 = vor.u32 %v4262_v30, %v3356_v29  ;;  %v3145_v51 = vor.u32 %v4205_v42, %v3142_v43  ;;  %v4133_v29 = vld [vmem:[#allocation2 + $0x9c] sm:$0xf]  ;;  %v2854_v30 = vld [vmem:[#allocation2 + $0xb0] sm:$0xf0]  ;;  %v4370_v42 = vld [vmem:[#allocation2 + $0x7fc] sm:$0xf0] }
  0x7c   :  { %2001 = vmatpush.bf16.msrb.mxu2 %v3261_v45  ;;  %v3717_v45 = vor.u32 %v4352_v32, %v3716_v31  ;;  %v4181_v31 = vld [vmem:[#allocation2 + $0x21c] sm:$0xf]  ;;  %v3046_v32 = vld [vmem:[#allocation2 + $0x230] sm:$0xf0]  ;;  %v2857_v36 = vor.u32 %v4133_v29, %v2854_v30  ;;  %v4127_v43 = vld [vmem:[#allocation2 + $0x6c] sm:$0xf] }
  0x7d   :  { %2014 = vmatpush.bf16.msrb.mxu3 %v3453_v49  ;;  %v4346_v49 = vld [vmem:[#allocation2 + $0x73c] sm:$0xf0]  ;;  %v3502_v30 = vld [vmem:[#allocation2 + $0x5c0] sm:$0xf0] }
  0x7e   :  { %1976 = vmatpush.bf16.msrb.mxu0 %v2853_v55  ;;  %v4199_v55 = vld [vmem:[#allocation2 + $0x2ac] sm:$0xf] }
  0x7f   :  { %1989 = vmatpush.bf16.msrb.mxu1 %v3045_v56  ;;  %v3118_v56 = vld [vmem:[#allocation2 + $0x2c0] sm:$0xf0] }
  0x80   :  { %2002 = vmatpush.bf16.msrb.mxu2 %v3237_v57  ;;  %v3693_v57 = vor.u32 %v4346_v49, %v3692_v48  ;;  %v3121_v63 = vor.u32 %v4199_v55, %v3118_v56  ;;  %v4121_v55 = vld [vmem:[#allocation2 + $0x3c] sm:$0xf]  ;;  %v2806_v56 = vld [vmem:[#allocation2 + $0x50] sm:$0xf0] }
  0x81   :  { %2015 = vmatpush.bf16.msrb.mxu3 %v3429_v61  ;;  %v4340_v61 = vld [vmem:[#allocation2 + $0x70c] sm:$0xf0] }
  0x82   :  { %1977 = vmatpush.bf16.msrb.mxu0 %v2829_v3  ;;  %v4193_v3 = vld [vmem:[#allocation2 + $0x27c] sm:$0xf] }
  0x83   :  { %1990 = vmatpush.bf16.msrb.mxu1 %v3021_v4  ;;  %v3094_v4 = vld [vmem:[#allocation2 + $0x290] sm:$0xf0] }
  0x84   :  { %2003 = vmatpush.bf16.msrb.mxu2 %v3213_v5  ;;  %v3669_v5 = vor.u32 %v4340_v61, %v3668_v60  ;;  %v3097_v11 = vor.u32 %v4193_v3, %v3094_v4  ;;  %v3548_v60 = vld [vmem:[#allocation2 + $0x608] sm:$0xf]  ;;  %v4310_v61 = vld [vmem:[#allocation2 + $0x61c] sm:$0xf0]  ;;  %v2782_v4 = vld [vmem:[#allocation2 + $0x20] sm:$0xf0] }
  0x85   :  { %2016 = vmatpush.bf16.msrb.mxu3 %v3405_v9  ;;  %v4334_v9 = vld [vmem:[#allocation2 + $0x6dc] sm:$0xf0] }
  0x86   :  { %1978 = vmatpush.bf16.msrb.mxu0 %v2805_v15  ;;  %v4187_v15 = vld [vmem:[#allocation2 + $0x24c] sm:$0xf]  ;;  %v3645_v17 = vor.u32 %v4334_v9, %v3644_v8  ;;  %v3334_v8 = vld [vmem:[#allocation2 + $0x470] sm:$0xf0]  ;;  %v4301_v9 = vld [vmem:[#allocation2 + $0x5dc] sm:$0xf] }
  0x87   :  { %1991 = vmatpush.bf16.msrb.mxu1 %v2997_v21  ;;  %v3837_v21 = vor.u32 %v4382_v12, %v3836_v10  ;;  %v3549_v10 = vor.u32 %v4310_v61, %v3548_v60  ;;  %v4349_v12 = vld [vmem:[#allocation2 + $0x75c] sm:$0xf]  ;;  %v3838_v60 = vld [vmem:[#allocation2 + $0x860] sm:$0xf0] }
  0x88   :  { %2004 = vmatpush.bf16.msrb.mxu2 %v3189_v23  ;;  %v2881_v23 = vor.u32 %v4139_v13, %v2878_v14  ;;  %v3718_v13 = vld [vmem:[#allocation2 + $0x770] sm:$0xf0]  ;;  %v3741_v14 = vor.u32 %v4358_v1, %v3740_v0 }
  0x89   :  { %2017 = vmatpush.bf16.msrb.mxu3 %v3381_v27  ;;  %v3073_v27 = vor.u32 %v4187_v15, %v3070_v16  ;;  %v2785_v15 = vor.u32 %v4115_v2, %v2782_v4  ;;  %v4397_v16 = vld [vmem:[#allocation2 + $0x8dc] sm:$0xf]  ;;  %v3721_v25 = vor.u32 %v4349_v12, %v3718_v13  ;;  %v3238_v1 = vld [vmem:[#allocation2 + $0x3b0] sm:$0xf0] }
  0x8a   :  { %1979 = vmatpush.bf16.msrb.mxu0 %v2781_v34  ;;  %v3813_v34 = vor.u32 %v4376_v28, %v3812_v26  ;;  %v4247_v26 = vld [vmem:[#allocation2 + $0x42c] sm:$0xf]  ;;  %v4277_v2 = vld [vmem:[#allocation2 + $0x51c] sm:$0xf] }
  0x8b   :  { %1992 = vmatpush.bf16.msrb.mxu1 %v2973_v40  ;;  %v3788_v40 = vld [vmem:[#allocation2 + $0x7e8] sm:$0xf]  ;;  %v4295_v28 = vld [vmem:[#allocation2 + $0x5ac] sm:$0xf] }
  0x8c   :  { %2005 = vmatpush.bf16.msrb.mxu2 %v3165_v41  ;;  %v3049_v41 = vor.u32 %v4181_v31, %v3046_v32  ;;  %v3789_v48 = vor.u32 %v4370_v42, %v3788_v40  ;;  %v4343_v31 = vld [vmem:[#allocation2 + $0x72c] sm:$0xf]  ;;  %v3694_v32 = vld [vmem:[#allocation2 + $0x740] sm:$0xf0]  ;;  %v4241_v40 = vld [vmem:[#allocation2 + $0x3fc] sm:$0xf] }
  0x8d   :  { %2018 = vmatpush.bf16.msrb.mxu3 %v3357_v44  ;;  %1980 = vmatmul.bf16.vlgmr.msrb.gmra.mxu0 %v4568_v19  ;;  %v2830_v44 = vld [vmem:[#allocation2 + $0x80] sm:$0xf0]  ;;  %v4289_v42 = vld [vmem:[#allocation2 + $0x57c] sm:$0xf] }
  0x8e   :  { %2024 = vmatpush.bf16.msra.mxu0 %v3717_v45  ;;  %1993 = vmatmul.bf16.vlgmr.msrb.gmra.mxu1 %v4572_v22  ;;  %v4175_v45 = vld [vmem:[#allocation2 + $0x1ec] sm:$0xf]  ;;  %v2833_v49 = vor.u32 %v4127_v43, %v2830_v44  ;;  %v3478_v44 = vld [vmem:[#allocation2 + $0x590] sm:$0xf0] }
  0x8f   :  { %2037 = vmatpush.bf16.msra.mxu1 %v3909_v46  ;;  %2006 = vmatmul.bf16.vlgmr.msrb.gmra.mxu2 %v4566_v18  ;;  %v3022_v46 = vld [vmem:[#allocation2 + $0x200] sm:$0xf0] }
  0x90   :  { %2050 = vmatpush.bf16.msra.mxu2 %v2953_v47  ;;  %2019 = vmatmul.bf16.vlgmr.msrb.gmra.mxu3 %v4570_v20  ;;  %v3597_v47 = vor.u32 %v4322_v39, %v3596_v37  ;;  %v3025_v53 = vor.u32 %v4175_v45, %v3022_v46  ;;  %v3505_v37 = vor.u32 %v4295_v28, %v3502_v30  ;;  %v4337_v45 = vld [vmem:[#allocation2 + $0x6fc] sm:$0xf]  ;;  %v3670_v46 = vld [vmem:[#allocation2 + $0x710] sm:$0xf0] }
  0x91   :  { %2063 = vmatpush.bf16.msra.mxu3 %v3145_v51  ;;  %v4316_v51 = vld [vmem:[#allocation2 + $0x64c] sm:$0xf0]  ;;  %v3697_v39 = vor.u32 %v4343_v31, %v3694_v32  ;;  %v4217_v31 = vld [vmem:[#allocation2 + $0x33c] sm:$0xf]  ;;  %v3190_v32 = vld [vmem:[#allocation2 + $0x350] sm:$0xf0] }
  0x92   :  { %2025 = vmatpush.bf16.msra.mxu0 %v3693_v57  ;;  %v4169_v57 = vld [vmem:[#allocation2 + $0x1bc] sm:$0xf] }
  0x93   :  { %2038 = vmatpush.bf16.msra.mxu1 %v3885_v58  ;;  %v2998_v58 = vld [vmem:[#allocation2 + $0x1d0] sm:$0xf0] }
  0x94   :  { %2051 = vmatpush.bf16.msra.mxu2 %v2929_v59  ;;  %v3573_v59 = vor.u32 %v4316_v51, %v3572_v50  ;;  %v3001_v3 = vor.u32 %v4169_v57, %v2998_v58  ;;  %v3481_v50 = vor.u32 %v4289_v42, %v3478_v44  ;;  %v3673_v51 = vor.u32 %v4337_v45, %v3670_v46  ;;  %v4331_v57 = vld [vmem:[#allocation2 + $0x6cc] sm:$0xf]  ;;  %v3646_v58 = vld [vmem:[#allocation2 + $0x6e0] sm:$0xf0]  ;;  %v4361_v42 = vld [vmem:[#allocation2 + $0x7bc] sm:$0xf] }
  0x95   :  { %2064 = vmatpush.bf16.msra.mxu3 %v3121_v63  ;;  %v2809_v63 = vor.u32 %v4121_v55, %v2806_v56  ;;  %v3454_v56 = vld [vmem:[#allocation2 + $0x560] sm:$0xf0]  ;;  %v3649_v0 = vor.u32 %v4331_v57, %v3646_v58  ;;  %v3193_v45 = vor.u32 %v4217_v31, %v3190_v32  ;;  %v4211_v46 = vld [vmem:[#allocation2 + $0x30c] sm:$0xf] }
  0x96   :  { %2026 = vmatpush.bf16.msra.mxu0 %v3669_v5  ;;  %v4163_v5 = vld [vmem:[#allocation2 + $0x18c] sm:$0xf]  ;;  %v3742_v57 = vld [vmem:[#allocation2 + $0x7a0] sm:$0xf0] }
  0x97   :  { %2039 = vmatpush.bf16.msra.mxu1 %v3861_v6  ;;  %v2974_v6 = vld [vmem:[#allocation2 + $0x1a0] sm:$0xf0] }
  0x98   :  { %2052 = vmatpush.bf16.msra.mxu2 %v2905_v7  ;;  %v4253_v7 = vld [vmem:[#allocation2 + $0x45c] sm:$0xf] }
  0x99   :  { %2065 = vmatpush.bf16.msra.mxu3 %v3097_v11  ;;  %v3526_v11 = vld [vmem:[#allocation2 + $0x5f0] sm:$0xf0] }
  0x9a   :  { %2027 = vmatpush.bf16.msra.mxu0 %v3645_v17  ;;  %v3910_v17 = vld [vmem:[#allocation2 + $0x8f0] sm:$0xf0]  ;;  %v3529_v24 = vor.u32 %v4301_v9, %v3526_v11  ;;  %v4223_v11 = vld [vmem:[#allocation2 + $0x36c] sm:$0xf] }
  0x9b   :  { %2040 = vmatpush.bf16.msra.mxu1 %v3837_v21  ;;  %v2977_v21 = vor.u32 %v4163_v5, %v2974_v6  ;;  %v3913_v29 = vor.u32 %v4397_v16, %v3910_v17  ;;  %v4325_v5 = vld [vmem:[#allocation2 + $0x69c] sm:$0xf]  ;;  %v3622_v6 = vld [vmem:[#allocation2 + $0x6b0] sm:$0xf0] }
  0x9c   :  { %2053 = vmatpush.bf16.msra.mxu2 %v2881_v23  ;;  %v3337_v23 = vor.u32 %v4253_v7, %v3334_v8  ;;  %v4604_v7 = vld [vmem:[%s4806_s2] sm:$0x3f]  ;;  %v4373_v8 = vld [vmem:[#allocation2 + $0x81c] sm:$0xf]  ;;  %v3814_v9 = vld [vmem:[#allocation2 + $0x830] sm:$0xf0]  ;;  %v3625_v13 = vor.u32 %v4325_v5, %v3622_v6 }
  0x9d   :  { %2066 = vmatpush.bf16.msra.mxu3 %v3073_v27  ;;  %v3310_v27 = vld [vmem:[#allocation2 + $0x440] sm:$0xf0]  ;;  %v343_v16 = vperm.slane %v4604_v7, 0  ;;  %v3817_v17 = vor.u32 %v4373_v8, %v3814_v9  ;;  %v3532_v8 = vld [vmem:[#allocation2 + $0x5e0] sm:$0xf] }
  0x9e   :  { %2028 = vmatpush.bf16.msra.mxu0 %v3621_v33  ;;  %v4391_v33 = vld [vmem:[#allocation2 + $0x8ac] sm:$0xf]  ;;  %v4305_v9 = vld [vmem:[#allocation2 + $0x5f4] sm:$0xf0] }
  0x9f   :  { %2041 = vmatpush.bf16.msra.mxu1 %v3813_v34  ;;  %v3886_v34 = vld [vmem:[#allocation2 + $0x8c0] sm:$0xf0] }
  0xa0   :  { %2054 = vmatpush.bf16.msra.mxu2 %v2857_v36  ;;  %v3313_v36 = vor.u32 %v4247_v26, %v3310_v27  ;;  %v3889_v43 = vor.u32 %v4391_v33, %v3886_v34  ;;  %v3790_v26 = vld [vmem:[#allocation2 + $0x800] sm:$0xf0]  ;;  %v4265_v33 = vld [vmem:[#allocation2 + $0x4bc] sm:$0xf] }
  0xa1   :  { %2067 = vmatpush.bf16.msra.mxu3 %v3049_v41  ;;  %v3286_v41 = vld [vmem:[#allocation2 + $0x410] sm:$0xf0] }
  0xa2   :  { %2029 = vmatpush.bf16.msra.mxu0 %v3597_v47  ;;  %v4385_v47 = vld [vmem:[#allocation2 + $0x87c] sm:$0xf] }
  0xa3   :  { %2042 = vmatpush.bf16.msra.mxu1 %v3789_v48  ;;  %v3862_v48 = vld [vmem:[#allocation2 + $0x890] sm:$0xf0] }
  0xa4   :  { %2055 = vmatpush.bf16.msra.mxu2 %v2833_v49  ;;  %v3289_v49 = vor.u32 %v4241_v40, %v3286_v41  ;;  %v3865_v55 = vor.u32 %v4385_v47, %v3862_v48  ;;  %v4313_v40 = vld [vmem:[#allocation2 + $0x63c] sm:$0xf]  ;;  %v3574_v41 = vld [vmem:[#allocation2 + $0x650] sm:$0xf0]  ;;  %v3166_v47 = vld [vmem:[#allocation2 + $0x320] sm:$0xf0] }
  0xa5   :  { %2068 = vmatpush.bf16.msra.mxu3 %v3025_v53  ;;  %v3262_v53 = vld [vmem:[#allocation2 + $0x3e0] sm:$0xf0] }
  0xa6   :  { %2030 = vmatpush.bf16.msra.mxu0 %v3573_v59  ;;  %v4379_v59 = vld [vmem:[#allocation2 + $0x84c] sm:$0xf]  ;;  %v3265_v61 = vor.u32 %v4235_v52, %v3262_v53 }
  0xa7   :  { %2043 = vmatpush.bf16.msra.mxu1 %v3765_v62  ;;  %v4229_v62 = vld [vmem:[#allocation2 + $0x39c] sm:$0xf]  ;;  %v3841_v4 = vor.u32 %v4379_v59, %v3838_v60  ;;  %v4307_v52 = vld [vmem:[#allocation2 + $0x60c] sm:$0xf]  ;;  %v2956_v60 = vld [vmem:[#allocation2 + $0x160] sm:$0xf] }
  0xa8   :  { %2056 = vmatpush.bf16.msra.mxu2 %v2809_v63  ;;  %v3457_v63 = vor.u32 %v4283_v54, %v3454_v56  ;;  %v4355_v56 = vld [vmem:[#allocation2 + $0x78c] sm:$0xf] }
  0xa9   :  { %2069 = vmatpush.bf16.msra.mxu3 %v3001_v3  ;;  %v3430_v3 = vld [vmem:[#allocation2 + $0x530] sm:$0xf0] }
  0xaa   :  { %2031 = vmatpush.bf16.msra.mxu0 %v3549_v10  ;;  %v3241_v10 = vor.u32 %v4229_v62, %v3238_v1  ;;  %v3433_v12 = vor.u32 %v4277_v2, %v3430_v3  ;;  %v1825_v28 = vpop.f32.mrf.mxu0  ;;  %v3148_v62 = vld [vmem:[#allocation2 + $0x2e0] sm:$0xf]  ;;  %v4257_v2 = vld [vmem:[#allocation2 + $0x474] sm:$0xf0] }
  0xab   :  { %2044 = vmatpush.bf16.msra.mxu1 %v3741_v14  ;;  %v3214_v14 = vld [vmem:[#allocation2 + $0x380] sm:$0xf0]  ;;  %v1826_v34 = vadd.f32 %v1825_v28, %v343_v16  ;;  %v3340_v1 = vld [vmem:[#allocation2 + $0x460] sm:$0xf]  ;;  %v4155_v16 = vld [vmem:[#allocation2 + $0x144] sm:$0xf0] }
  0xac   :  { %2057 = vmatpush.bf16.msra.mxu2 %v2785_v15  ;;  %v4271_v15 = vld [vmem:[#allocation2 + $0x4ec] sm:$0xf]  ;;  %v3217_v27 = vor.u32 %v4223_v11, %v3214_v14  ;;  %v3745_v11 = vor.u32 %v4355_v56, %v3742_v57  ;;  %v3341_v14 = vor.u32 %v4257_v2, %v3340_v1  ;;  %v4185_v2 = vld [vmem:[#allocation2 + $0x234] sm:$0xf0] }
  0xad   :  { %2070 = vmatpush.bf16.msra.mxu3 %v2977_v21  ;;  %2032 = vmatmul.bf16.vlgmr.msra.gmra.mxu0 %v4581_v35  ;;  %v3406_v21 = vld [vmem:[#allocation2 + $0x500] sm:$0xf0] }
  0xae   :  { %2076 = vmatpush.bf16.msrb.mxu0 %v3337_v23  ;;  %2045 = vmatmul.bf16.vlgmr.msra.gmra.mxu1 %v4583_v38  ;;  %v4319_v23 = vld [vmem:[#allocation2 + $0x66c] sm:$0xf] }
  0xaf   :  { %2089 = vmatpush.bf16.msrb.mxu1 %v3529_v24  ;;  %2058 = vmatmul.bf16.vlgmr.msra.gmra.mxu2 %v4568_v19  ;;  %v3598_v24 = vld [vmem:[#allocation2 + $0x680] sm:$0xf0] }
  0xb0   :  { %2102 = vmatpush.bf16.msrb.mxu2 %v3721_v25  ;;  %2071 = vmatmul.bf16.vlgmr.msra.gmra.mxu3 %v4572_v22  ;;  %v4367_v25 = vld [vmem:[#allocation2 + $0x7ec] sm:$0xf]  ;;  %v3601_v30 = vor.u32 %v4319_v23, %v3598_v24  ;;  %v4203_v23 = vld [vmem:[#allocation2 + $0x2c4] sm:$0xf0]  ;;  %v3316_v24 = vld [vmem:[#allocation2 + $0x430] sm:$0xf] }
  0xb1   :  { %2115 = vmatpush.bf16.msrb.mxu3 %v3913_v29  ;;  %v3409_v29 = vor.u32 %v4271_v15, %v3406_v21  ;;  %v2932_v15 = vld [vmem:[#allocation2 + $0x130] sm:$0xf]  ;;  %v3533_v21 = vor.u32 %v4305_v9, %v3532_v8  ;;  %v3436_v8 = vld [vmem:[#allocation2 + $0x520] sm:$0xf]  ;;  %v4281_v9 = vld [vmem:[#allocation2 + $0x534] sm:$0xf0] }
  0xb2   :  { %2077 = vmatpush.bf16.msrb.mxu0 %v3313_v36  ;;  %v1838_v36 = vpop.f32.mrf.mxu1  ;;  %v1851_v53 = vpop.f32.mrf.mxu2 }
  0xb3   :  { %2090 = vmatpush.bf16.msrb.mxu1 %v3505_v37  ;;  %v3793_v37 = vor.u32 %v4367_v25, %v3790_v26  ;;  %v1839_v44 = vadd.f32 %v1838_v36, %v1826_v34  ;;  %v1864_v59 = vpop.f32.mrf.mxu3  ;;  %v4251_v25 = vld [vmem:[#allocation2 + $0x444] sm:$0xf0]  ;;  %v3508_v26 = vld [vmem:[#allocation2 + $0x5b0] sm:$0xf]  ;;  %v4149_v34 = vld [vmem:[#allocation2 + $0x114] sm:$0xf0] }
  0xb4   :  { %2103 = vmatpush.bf16.msrb.mxu2 %v3697_v39  ;;  %v3382_v39 = vld [vmem:[#allocation2 + $0x4d0] sm:$0xf0]  ;;  %v3317_v32 = vor.u32 %v4251_v25, %v3316_v24  ;;  %v3100_v36 = vld [vmem:[#allocation2 + $0x280] sm:$0xf]  ;;  %v3412_v25 = vld [vmem:[#allocation2 + $0x4f0] sm:$0xf] }
  0xb5   :  { %2116 = vmatpush.bf16.msrb.mxu3 %v3889_v43  ;;  %v3766_v43 = vld [vmem:[#allocation2 + $0x7d0] sm:$0xf0]  ;;  %v3385_v48 = vor.u32 %v4265_v33, %v3382_v39  ;;  %v1852_v58 = vadd.f32 %v1851_v53, %v1839_v44  ;;  %v2908_v33 = vld [vmem:[#allocation2 + $0x100] sm:$0xf]  ;;  %v4197_v39 = vld [vmem:[#allocation2 + $0x294] sm:$0xf0] }
  0xb6   :  { %2078 = vmatpush.bf16.msrb.mxu0 %v3289_v49  ;;  %v3577_v49 = vor.u32 %v4313_v40, %v3574_v41  ;;  %v3769_v54 = vor.u32 %v4361_v42, %v3766_v43  ;;  %v3292_v40 = vld [vmem:[#allocation2 + $0x400] sm:$0xf]  ;;  %v4245_v41 = vld [vmem:[#allocation2 + $0x414] sm:$0xf0]  ;;  %v2909_v44 = vor.u32 %v4149_v34, %v2908_v33  ;;  %v4239_v53 = vld [vmem:[#allocation2 + $0x3e4] sm:$0xf0] }
  0xb7   :  { %2091 = vmatpush.bf16.msrb.mxu1 %v3481_v50  ;;  %v4259_v50 = vld [vmem:[#allocation2 + $0x48c] sm:$0xf]  ;;  %v4607_v3 = vadd.f32 %v1864_v59, %v1852_v58  ;;  %v3484_v42 = vld [vmem:[#allocation2 + $0x580] sm:$0xf]  ;;  %v4293_v43 = vld [vmem:[#allocation2 + $0x594] sm:$0xf0] }
  0xb8   :  { %2104 = vmatpush.bf16.msrb.mxu2 %v3673_v51  ;;  %v3358_v51 = vld [vmem:[#allocation2 + $0x4a0] sm:$0xf0]  ;;  %v2812_v34 = vld [vmem:[#allocation2 + $0x40] sm:$0xf] }
  0xb9   :  { %2117 = vmatpush.bf16.msrb.mxu3 %v3865_v55  ;;  %v3550_v55 = vld [vmem:[#allocation2 + $0x620] sm:$0xf0]  ;;  %v3361_v5 = vor.u32 %v4259_v50, %v3358_v51  ;;  %v3485_v50 = vor.u32 %v4293_v43, %v3484_v42  ;;  %v4191_v51 = vld [vmem:[#allocation2 + $0x264] sm:$0xf0]  ;;  %v3196_v42 = vld [vmem:[#allocation2 + $0x340] sm:$0xf] }
  0xba   :  { %2079 = vmatpush.bf16.msrb.mxu0 %v3265_v61  ;;  %v4161_v61 = vld [vmem:[#allocation2 + $0x174] sm:$0xf0]  ;;  %v3553_v6 = vor.u32 %v4307_v52, %v3550_v55  ;;  %v1853_v28 = vpop.f32.mrf.mxu2  ;;  %v3268_v52 = vld [vmem:[#allocation2 + $0x3d0] sm:$0xf]  ;;  %v4287_v55 = vld [vmem:[#allocation2 + $0x564] sm:$0xf0] }
  0xbb   :  { %2092 = vmatpush.bf16.msrb.mxu1 %v3457_v63  ;;  %v3169_v63 = vor.u32 %v4211_v46, %v3166_v47  ;;  %v3293_v46 = vor.u32 %v4245_v41, %v3292_v40  ;;  %v2884_v47 = vld [vmem:[#allocation2 + $0xd0] sm:$0xf]  ;;  %v4173_v41 = vld [vmem:[#allocation2 + $0x1d4] sm:$0xf0] }
  0xbc   :  { %2105 = vmatpush.bf16.msrb.mxu2 %v3649_v0  ;;  %v4209_v0 = vld [vmem:[#allocation2 + $0x2f4] sm:$0xf0] }
  0xbd   :  { %2118 = vmatpush.bf16.msrb.mxu3 %v3841_v4  ;;  %v1827_v4 = vpop.f32.mrf.mxu0  ;;  %v4221_v43 = vld [vmem:[#allocation2 + $0x354] sm:$0xf0] }
  0xbe   :  { %2080 = vmatpush.bf16.msrb.mxu0 %v3241_v10  ;;  %v1840_v10 = vpop.f32.mrf.mxu1  ;;  %v3244_v4 = vld [vmem:[#allocation2 + $0x3a0] sm:$0xf] }
  0xbf   :  { %2093 = vmatpush.bf16.msrb.mxu1 %v3433_v12  ;;  %v2957_v12 = vor.u32 %v4161_v61, %v2956_v60  ;;  %v3269_v61 = vor.u32 %v4239_v53, %v3268_v52  ;;  %v344_v10 = vperm.slane %v4604_v7, 1  ;;  %v4167_v52 = vld [vmem:[#allocation2 + $0x1a4] sm:$0xf0]  ;;  %v3172_v53 = vld [vmem:[#allocation2 + $0x310] sm:$0xf] }
  0xc0   :  { %2106 = vmatpush.bf16.msrb.mxu2 %v3625_v13  ;;  %v3149_v13 = vor.u32 %v4209_v0, %v3148_v62  ;;  %v2860_v62 = vld [vmem:[#allocation2 + $0xa0] sm:$0xf] }
  0xc1   :  { %2119 = vmatpush.bf16.msrb.mxu3 %v3817_v17  ;;  %v3124_v17 = vld [vmem:[#allocation2 + $0x2b0] sm:$0xf]  ;;  %v3052_v0 = vld [vmem:[#allocation2 + $0x220] sm:$0xf] }
  0xc2   :  { %2081 = vmatpush.bf16.msrb.mxu0 %v3217_v27  ;;  %v4299_v27 = vld [vmem:[#allocation2 + $0x5c4] sm:$0xf0]  ;;  %v3125_v31 = vor.u32 %v4203_v23, %v3124_v17 }
  0xc3   :  { %2094 = vmatpush.bf16.msrb.mxu1 %v3409_v29  ;;  %v2933_v29 = vor.u32 %v4155_v16, %v2932_v15  ;;  %v3028_v15 = vld [vmem:[#allocation2 + $0x1f0] sm:$0xf]  ;;  %v3437_v16 = vor.u32 %v4281_v9, %v3436_v8  ;;  %v4179_v17 = vld [vmem:[#allocation2 + $0x204] sm:$0xf0]  ;;  %v4206_v8 = vld [vmem:[#allocation2 + $0x2e4] sm:$0xf] }
  0xc4   :  { %2107 = vmatpush.bf16.msrb.mxu2 %v3601_v30  ;;  %v1866_v30 = vpop.f32.mrf.mxu3  ;;  %v4227_v23 = vld [vmem:[#allocation2 + $0x384] sm:$0xf0]  ;;  %v3150_v9 = vld [vmem:[#allocation2 + $0x2f8] sm:$0xf0] }
  0xc5   :  { %2120 = vmatpush.bf16.msrb.mxu3 %v3793_v37  ;;  %v3509_v37 = vor.u32 %v4299_v27, %v3508_v26  ;;  %v4275_v26 = vld [vmem:[#allocation2 + $0x504] sm:$0xf0] }
  0xc6   :  { %2082 = vmatpush.bf16.msrb.mxu0 %v3193_v45  ;;  %v3101_v45 = vor.u32 %v4197_v39, %v3100_v36  ;;  %v4125_v36 = vld [vmem:[#allocation2 + $0x54] sm:$0xf0]  ;;  %v3413_v40 = vor.u32 %v4275_v26, %v3412_v25  ;;  %v3126_v25 = vld [vmem:[#allocation2 + $0x2c8] sm:$0xf0] }
  0xc7   :  { %2095 = vmatpush.bf16.msrb.mxu1 %v3385_v48  ;;  %v4143_v48 = vld [vmem:[#allocation2 + $0xe4] sm:$0xf0] }
  0xc8   :  { %2108 = vmatpush.bf16.msrb.mxu2 %v3577_v49  ;;  %v3076_v49 = vld [vmem:[#allocation2 + $0x250] sm:$0xf]  ;;  %v2885_v57 = vor.u32 %v4143_v48, %v2884_v47  ;;  %v4119_v48 = vld [vmem:[#allocation2 + $0x24] sm:$0xf0] }
  0xc9   :  { %2121 = vmatpush.bf16.msrb.mxu3 %v3769_v54  ;;  %v3460_v54 = vld [vmem:[#allocation2 + $0x550] sm:$0xf]  ;;  %v3077_v60 = vor.u32 %v4191_v51, %v3076_v49 }
  0xca   :  { %2083 = vmatpush.bf16.msrb.mxu0 %v3169_v63  ;;  %v1877_v56 = vpop.f32.mrf.mxu0  ;;  %v4137_v63 = vld [vmem:[#allocation2 + $0xb4] sm:$0xf0]  ;;  %v3461_v1 = vor.u32 %v4287_v55, %v3460_v54  ;;  %v2788_v47 = vld [vmem:[#allocation2 + $0x10] sm:$0xf]  ;;  %v4215_v55 = vld [vmem:[#allocation2 + $0x324] sm:$0xf0] }
  0xcb   :  { %2096 = vmatpush.bf16.msrb.mxu1 %v3361_v5  ;;  %v1878_v58 = vadd.f32 %v1877_v56, %v4607_v3  ;;  %v1890_v59 = vpop.f32.mrf.mxu1  ;;  %v4233_v5 = vld [vmem:[#allocation2 + $0x3b4] sm:$0xf0]  ;;  %v2861_v3 = vor.u32 %v4137_v63, %v2860_v62  ;;  %v2980_v51 = vld [vmem:[#allocation2 + $0x190] sm:$0xf]  ;;  %v2789_v63 = vor.u32 %v4119_v48, %v2788_v47  ;;  %v4383_v48 = vld [vmem:[#allocation2 + $0x864] sm:$0xf0] }
  0xcc   :  { %2109 = vmatpush.bf16.msrb.mxu2 %v3553_v6  ;;  %v3364_v56 = vld [vmem:[#allocation2 + $0x490] sm:$0xf] }
  0xcd   :  { %2122 = vmatpush.bf16.msrb.mxu3 %v3745_v11  ;;  %2084 = vmatmul.bf16.vlgmr.msrb.gmra.mxu0 %v4566_v18  ;;  %v4614_v6 = vadd.f32 %v1890_v59, %v1878_v58  ;;  %v3053_v11 = vor.u32 %v4185_v2, %v3052_v0  ;;  %v3724_v59 = vld [vmem:[#allocation2 + $0x760] sm:$0xf]  ;;  %v4401_v0 = vld [vmem:[#allocation2 + $0x8f4] sm:$0xf0]  ;;  %v2958_v2 = vld [vmem:[#allocation2 + $0x178] sm:$0xf0] }
  0xce   :  { %2128 = vmatpush.bf16.msra.mxu0 %v2957_v12  ;;  %2097 = vmatmul.bf16.vlgmr.msrb.gmra.mxu1 %v4570_v20  ;;  %v3245_v12 = vor.u32 %v4233_v5, %v3244_v4  ;;  %v2981_v4 = vor.u32 %v4167_v52, %v2980_v51  ;;  %v3173_v5 = vor.u32 %v4215_v55, %v3172_v53  ;;  %v4188_v51 = vld [vmem:[#allocation2 + $0x254] sm:$0xf]  ;;  %v3078_v52 = vld [vmem:[#allocation2 + $0x268] sm:$0xf0] }
  0xcf   :  { %2141 = vmatpush.bf16.msra.mxu1 %v3149_v13  ;;  %2110 = vmatmul.bf16.vlgmr.msrb.gmra.mxu2 %v4581_v35  ;;  %v2836_v13 = vld [vmem:[#allocation2 + $0x70] sm:$0xf] }
  0xd0   :  { %2154 = vmatpush.bf16.msra.mxu2 %v3341_v14  ;;  %2123 = vmatmul.bf16.vlgmr.msrb.gmra.mxu3 %v4583_v38  ;;  %v4131_v14 = vld [vmem:[#allocation2 + $0x84] sm:$0xf0] }
  0xd1   :  { %2167 = vmatpush.bf16.msra.mxu3 %v3533_v21  ;;  %v3220_v21 = vld [vmem:[#allocation2 + $0x370] sm:$0xf]  ;;  %v2837_v30 = vor.u32 %v4131_v14, %v2836_v13  ;;  %v4347_v14 = vld [vmem:[#allocation2 + $0x744] sm:$0xf0] }
  0xd2   :  { %2129 = vmatpush.bf16.msra.mxu0 %v2933_v29  ;;  %v1903_v24 = vpop.f32.mrf.mxu2  ;;  %v1879_v29 = vpop.f32.mrf.mxu0  ;;  %v3221_v33 = vor.u32 %v4227_v23, %v3220_v21  ;;  %v3700_v13 = vld [vmem:[#allocation2 + $0x730] sm:$0xf]  ;;  %v4152_v21 = vld [vmem:[#allocation2 + $0x134] sm:$0xf]  ;;  %v2934_v23 = vld [vmem:[#allocation2 + $0x148] sm:$0xf0] }
  0xd3   :  { %2142 = vmatpush.bf16.msra.mxu1 %v3125_v31  ;;  %v1904_v27 = vadd.f32 %v1903_v24, %v344_v10  ;;  %v1916_v28 = vpop.f32.mrf.mxu3  ;;  %v1892_v31 = vpop.f32.mrf.mxu1  ;;  %v4200_v24 = vld [vmem:[#allocation2 + $0x2b4] sm:$0xf]  ;;  %v3701_v26 = vor.u32 %v4347_v14, %v3700_v13  ;;  %v3676_v29 = vld [vmem:[#allocation2 + $0x700] sm:$0xf]  ;;  %v4371_v14 = vld [vmem:[#allocation2 + $0x804] sm:$0xf0] }
  0xd4   :  { %2155 = vmatpush.bf16.msra.mxu2 %v3317_v32  ;;  %v3029_v32 = vor.u32 %v4179_v17, %v3028_v15  ;;  %v3892_v15 = vld [vmem:[#allocation2 + $0x8b0] sm:$0xf]  ;;  %v4395_v17 = vld [vmem:[#allocation2 + $0x8c4] sm:$0xf0]  ;;  %v3868_v31 = vld [vmem:[#allocation2 + $0x880] sm:$0xf] }
  0xd5   :  { %2168 = vmatpush.bf16.msra.mxu3 %v3509_v37  ;;  %v3004_v37 = vld [vmem:[#allocation2 + $0x1c0] sm:$0xf]  ;;  %v4617_v39 = vadd.f32 %v1916_v28, %v1904_v27  ;;  %v3893_v27 = vor.u32 %v4395_v17, %v3892_v15  ;;  %v2937_v28 = vor.u32 %v4152_v21, %v2934_v23  ;;  %v4128_v15 = vld [vmem:[#allocation2 + $0x74] sm:$0xf] }
  0xd6   :  { %2130 = vmatpush.bf16.msra.mxu0 %v2909_v44  ;;  %v3388_v44 = vld [vmem:[#allocation2 + $0x4c0] sm:$0xf]  ;;  %v3005_v49 = vor.u32 %v4173_v41, %v3004_v37  ;;  %v4194_v37 = vld [vmem:[#allocation2 + $0x284] sm:$0xf]  ;;  %v4176_v23 = vld [vmem:[#allocation2 + $0x1f4] sm:$0xf] }
  0xd7   :  { %2143 = vmatpush.bf16.msra.mxu1 %v3101_v45  ;;  %v4269_v45 = vld [vmem:[#allocation2 + $0x4d4] sm:$0xf0] }
  0xd8   :  { %2156 = vmatpush.bf16.msra.mxu2 %v3293_v46  ;;  %v2813_v46 = vor.u32 %v4125_v36, %v2812_v34  ;;  %v3389_v54 = vor.u32 %v4269_v45, %v3388_v44  ;;  %v4146_v34 = vld [vmem:[#allocation2 + $0x104] sm:$0xf]  ;;  %v2910_v36 = vld [vmem:[#allocation2 + $0x118] sm:$0xf0]  ;;  %v3652_v44 = vld [vmem:[#allocation2 + $0x6d0] sm:$0xf] }
  0xd9   :  { %2169 = vmatpush.bf16.msra.mxu3 %v3485_v50  ;;  %v3197_v50 = vor.u32 %v4221_v43, %v3196_v42  ;;  %v2913_v43 = vor.u32 %v4146_v34, %v2910_v36  ;;  %v4335_v45 = vld [vmem:[#allocation2 + $0x6e4] sm:$0xf0]  ;;  %v4365_v36 = vld [vmem:[#allocation2 + $0x7d4] sm:$0xf0] }
  0xda   :  { %2131 = vmatpush.bf16.msra.mxu0 %v2885_v57  ;;  %v4263_v57 = vld [vmem:[#allocation2 + $0x4a4] sm:$0xf0]  ;;  %v1905_v58 = vpop.f32.mrf.mxu2  ;;  %v3653_v53 = vor.u32 %v4335_v45, %v3652_v44  ;;  %v3556_v44 = vld [vmem:[#allocation2 + $0x610] sm:$0xf] }
  0xdb   :  { %2144 = vmatpush.bf16.msra.mxu1 %v3077_v60  ;;  %v4353_v60 = vld [vmem:[#allocation2 + $0x774] sm:$0xf0]  ;;  %v1918_v62 = vpop.f32.mrf.mxu3  ;;  %v3365_v10 = vor.u32 %v4263_v57, %v3364_v56  ;;  %v3628_v57 = vld [vmem:[#allocation2 + $0x6a0] sm:$0xf]  ;;  %v4311_v45 = vld [vmem:[#allocation2 + $0x624] sm:$0xf0] }
  0xdc   :  { %2157 = vmatpush.bf16.msra.mxu2 %v3269_v61  ;;  %v3916_v61 = vld [vmem:[#allocation2 + $0x8e0] sm:$0xf]  ;;  %v4329_v58 = vld [vmem:[#allocation2 + $0x6b4] sm:$0xf0]  ;;  %v3081_v62 = vor.u32 %v4188_v51, %v3078_v52 }
  0xdd   :  { %2170 = vmatpush.bf16.msra.mxu3 %v3461_v1  ;;  %v4158_v1 = vld [vmem:[#allocation2 + $0x164] sm:$0xf] }
  0xde   :  { %2132 = vmatpush.bf16.msra.mxu0 %v2861_v3  ;;  %v3725_v3 = vor.u32 %v4353_v60, %v3724_v59  ;;  %v3820_v59 = vld [vmem:[#allocation2 + $0x820] sm:$0xf] }
  0xdf   :  { %2145 = vmatpush.bf16.msra.mxu1 %v3053_v11  ;;  %v3917_v11 = vor.u32 %v4401_v0, %v3916_v61  ;;  %v4134_v0 = vld [vmem:[#allocation2 + $0xa4] sm:$0xf] }
  0xe0   :  { %2158 = vmatpush.bf16.msra.mxu2 %v3245_v12  ;;  %v2961_v12 = vor.u32 %v4158_v1, %v2958_v2  ;;  %v2862_v1 = vld [vmem:[#allocation2 + $0xb8] sm:$0xf0]  ;;  %v4182_v2 = vld [vmem:[#allocation2 + $0x224] sm:$0xf] }
  0xe1   :  { %2171 = vmatpush.bf16.msra.mxu3 %v3437_v16  ;;  %v3153_v16 = vor.u32 %v4206_v8, %v3150_v9  ;;  %v3629_v8 = vor.u32 %v4329_v58, %v3628_v57  ;;  %v4254_v57 = vld [vmem:[#allocation2 + $0x464] sm:$0xf]  ;;  %v3342_v58 = vld [vmem:[#allocation2 + $0x478] sm:$0xf0] }
  0xe2   :  { %2133 = vmatpush.bf16.msra.mxu0 %v2837_v30  ;;  %v4341_v30 = vld [vmem:[#allocation2 + $0x714] sm:$0xf0] }
  0xe3   :  { %2146 = vmatpush.bf16.msra.mxu1 %v3029_v32  ;;  %v3129_v32 = vor.u32 %v4200_v24, %v3126_v25  ;;  %v3677_v41 = vor.u32 %v4341_v30, %v3676_v29  ;;  %v3030_v24 = vld [vmem:[#allocation2 + $0x208] sm:$0xf0]  ;;  %v3580_v30 = vld [vmem:[#allocation2 + $0x640] sm:$0xf] }
  0xe4   :  { %2159 = vmatpush.bf16.msra.mxu2 %v3221_v33  ;;  %v4389_v33 = vld [vmem:[#allocation2 + $0x894] sm:$0xf0]  ;;  %v3033_v34 = vor.u32 %v4176_v23, %v3030_v24 }
  0xe5   :  { %2172 = vmatpush.bf16.msra.mxu3 %v3413_v40  ;;  %v3102_v40 = vld [vmem:[#allocation2 + $0x298] sm:$0xf0]  ;;  %v3869_v42 = vor.u32 %v4389_v33, %v3868_v31  ;;  %v4317_v31 = vld [vmem:[#allocation2 + $0x654] sm:$0xf0] }
  0xe6   :  { %2134 = vmatpush.bf16.msra.mxu0 %v2813_v46  ;;  %v3844_v46 = vld [vmem:[#allocation2 + $0x850] sm:$0xf]  ;;  %v3105_v47 = vor.u32 %v4194_v37, %v3102_v40  ;;  %v4122_v37 = vld [vmem:[#allocation2 + $0x44] sm:$0xf]  ;;  %v2814_v40 = vld [vmem:[#allocation2 + $0x58] sm:$0xf0] }
  0xe7   :  { %2147 = vmatpush.bf16.msra.mxu1 %v3005_v49  ;;  %v4140_v49 = vld [vmem:[#allocation2 + $0xd4] sm:$0xf]  ;;  %v3845_v55 = vor.u32 %v4383_v48, %v3844_v46  ;;  %v3748_v48 = vld [vmem:[#allocation2 + $0x790] sm:$0xf] }
  0xe8   :  { %2160 = vmatpush.bf16.msra.mxu2 %v3197_v50  ;;  %v2886_v50 = vld [vmem:[#allocation2 + $0xe8] sm:$0xf0] }
  0xe9   :  { %2173 = vmatpush.bf16.msra.mxu3 %v3389_v54  ;;  %v2889_v56 = vor.u32 %v4140_v49, %v2886_v50  ;;  %v4359_v49 = vld [vmem:[#allocation2 + $0x7a4] sm:$0xf0]  ;;  %v4116_v50 = vld [vmem:[#allocation2 + $0x14] sm:$0xf] }
  0xea   :  { %2135 = vmatpush.bf16.msra.mxu0 %v2789_v63  ;;  %v1929_v54 = vpop.f32.mrf.mxu0  ;;  %v4377_v63 = vld [vmem:[#allocation2 + $0x834] sm:$0xf0] }
  0xeb   :  { %2148 = vmatpush.bf16.msra.mxu1 %v2981_v4  ;;  %v1930_v60 = vadd.f32 %v1929_v54, %v4617_v39  ;;  %v1942_v61 = vpop.f32.mrf.mxu1  ;;  %v3054_v4 = vld [vmem:[#allocation2 + $0x238] sm:$0xf0]  ;;  %v3821_v9 = vor.u32 %v4377_v63, %v3820_v59  ;;  %v4164_v54 = vld [vmem:[#allocation2 + $0x194] sm:$0xf]  ;;  %v4302_v59 = vld [vmem:[#allocation2 + $0x5e4] sm:$0xf] }
  0xec   :  { %2161 = vmatpush.bf16.msra.mxu2 %v3173_v5  ;;  %v3057_v39 = vor.u32 %v4182_v2, %v3054_v4  ;;  %v3726_v63 = vld [vmem:[#allocation2 + $0x778] sm:$0xf0]  ;;  %v4398_v2 = vld [vmem:[#allocation2 + $0x8e4] sm:$0xf] }
  0xed   :  { %2174 = vmatpush.bf16.msra.mxu3 %v3365_v10  ;;  %2136 = vmatmul.bf16.vlgmr.msra.gmra.mxu0 %v4568_v19  ;;  %v1943_v5 = vadd.f32 %v1942_v61, %v1930_v60  ;;  %v2865_v10 = vor.u32 %v4134_v0, %v2862_v1  ;;  %v3557_v60 = vor.u32 %v4311_v45, %v3556_v44  ;;  %v3534_v61 = vld [vmem:[#allocation2 + $0x5f8] sm:$0xf0]  ;;  %v3462_v45 = vld [vmem:[#allocation2 + $0x568] sm:$0xf0] }
  0xee   :  { %2180 = vmatpush.bf16.msrb.mxu0 %v3725_v3  ;;  %2149 = vmatmul.bf16.vlgmr.msra.gmra.mxu1 %v4572_v22  ;;  %v3604_v3 = vld [vmem:[#allocation2 + $0x670] sm:$0xf]  ;;  %v3749_v0 = vor.u32 %v4359_v49, %v3748_v48  ;;  %v3918_v4 = vld [vmem:[#allocation2 + $0x8f8] sm:$0xf0]  ;;  %v4380_v48 = vld [vmem:[#allocation2 + $0x854] sm:$0xf] }
  0xef   :  { %2193 = vmatpush.bf16.msrb.mxu1 %v3917_v11  ;;  %2162 = vmatmul.bf16.vlgmr.msra.gmra.mxu2 %v4566_v18  ;;  %v4323_v11 = vld [vmem:[#allocation2 + $0x684] sm:$0xf0] }
  0xf0   :  { %2206 = vmatpush.bf16.msrb.mxu2 %v2961_v12  ;;  %2175 = vmatmul.bf16.vlgmr.msra.gmra.mxu3 %v4570_v20  ;;  %v3796_v12 = vld [vmem:[#allocation2 + $0x7f0] sm:$0xf]  ;;  %v3605_v25 = vor.u32 %v4323_v11, %v3604_v3  ;;  %v4248_v3 = vld [vmem:[#allocation2 + $0x434] sm:$0xf]  ;;  %v3318_v11 = vld [vmem:[#allocation2 + $0x448] sm:$0xf0] }
  0xf1   :  { %2219 = vmatpush.bf16.msrb.mxu3 %v3153_v16  ;;  %v2838_v16 = vld [vmem:[#allocation2 + $0x88] sm:$0xf0] }
  0xf2   :  { %2181 = vmatpush.bf16.msrb.mxu0 %v3701_v26  ;;  %v1955_v13 = vpop.f32.mrf.mxu2  ;;  %v2841_v29 = vor.u32 %v4128_v15, %v2838_v16  ;;  %v3702_v15 = vld [vmem:[#allocation2 + $0x748] sm:$0xf0]  ;;  %v4392_v16 = vld [vmem:[#allocation2 + $0x8b4] sm:$0xf] }
  0xf3   :  { %2194 = vmatpush.bf16.msrb.mxu1 %v3893_v27  ;;  %v1956_v17 = vadd.f32 %v1955_v13, %v1943_v5  ;;  %v1968_v21 = vpop.f32.mrf.mxu3  ;;  %v1931_v27 = vpop.f32.mrf.mxu0  ;;  %v3921_v13 = vor.u32 %v4398_v2, %v3918_v4  ;;  %v3222_v2 = vld [vmem:[#allocation2 + $0x388] sm:$0xf0]  ;;  %v4272_v4 = vld [vmem:[#allocation2 + $0x4f4] sm:$0xf] }
  0xf4   :  { %2207 = vmatpush.bf16.msrb.mxu2 %v2937_v28  ;;  %v3797_v28 = vor.u32 %v4371_v14, %v3796_v12  ;;  %v1944_v33 = vpop.f32.mrf.mxu1  ;;  %v4296_v12 = vld [vmem:[#allocation2 + $0x5b4] sm:$0xf]  ;;  %v3294_v27 = vld [vmem:[#allocation2 + $0x418] sm:$0xf0] }
  0xf5   :  { %2220 = vmatpush.bf16.msrb.mxu3 %v3129_v32  ;;  %v4624_v26 = vadd.f32 %v1968_v21, %v1956_v17  ;;  %v3772_v32 = vld [vmem:[#allocation2 + $0x7c0] sm:$0xf]  ;;  %v4344_v14 = vld [vmem:[#allocation2 + $0x734] sm:$0xf]  ;;  %v3894_v17 = vld [vmem:[#allocation2 + $0x8c8] sm:$0xf0]  ;;  %v3321_v21 = vor.u32 %v4248_v3, %v3318_v11 }
  0xf6   :  { %2182 = vmatpush.bf16.msrb.mxu0 %v3677_v41  ;;  %v4170_v41 = vld [vmem:[#allocation2 + $0x1c4] sm:$0xf]  ;;  %v3773_v46 = vor.u32 %v4365_v36, %v3772_v32  ;;  %v3705_v24 = vor.u32 %v4344_v14, %v3702_v15  ;;  %v3678_v32 = vld [vmem:[#allocation2 + $0x718] sm:$0xf0]  ;;  %v4368_v11 = vld [vmem:[#allocation2 + $0x7f4] sm:$0xf] }
  0xf7   :  { %2195 = vmatpush.bf16.msrb.mxu1 %v3869_v42  ;;  %v3006_v42 = vld [vmem:[#allocation2 + $0x1d8] sm:$0xf0]  ;;  %v4386_v33 = vld [vmem:[#allocation2 + $0x884] sm:$0xf] }
  0xf8   :  { %2208 = vmatpush.bf16.msrb.mxu2 %v2913_v43  ;;  %v3581_v43 = vor.u32 %v4317_v31, %v3580_v30  ;;  %v3009_v52 = vor.u32 %v4170_v41, %v3006_v42  ;;  %v3486_v30 = vld [vmem:[#allocation2 + $0x598] sm:$0xf0]  ;;  %v4338_v31 = vld [vmem:[#allocation2 + $0x704] sm:$0xf]  ;;  %v4236_v41 = vld [vmem:[#allocation2 + $0x3d4] sm:$0xf] }
  0xf9   :  { %2221 = vmatpush.bf16.msrb.mxu3 %v3105_v47  ;;  %v2817_v47 = vor.u32 %v4122_v37, %v2814_v40  ;;  %v3681_v40 = vor.u32 %v4338_v31, %v3678_v32  ;;  %v3270_v42 = vld [vmem:[#allocation2 + $0x3e8] sm:$0xf0]  ;;  %v3774_v31 = vld [vmem:[#allocation2 + $0x7d8] sm:$0xf0] }
  0xfa   :  { %2183 = vmatpush.bf16.msrb.mxu0 %v3653_v53  ;;  %v1957_v51 = vpop.f32.mrf.mxu2  ;;  %v2790_v53 = vld [vmem:[#allocation2 + $0x28] sm:$0xf0] }
  0xfb   :  { %2196 = vmatpush.bf16.msrb.mxu1 %v3845_v55  ;;  %v2982_v55 = vld [vmem:[#allocation2 + $0x1a8] sm:$0xf0]  ;;  %v2793_v1 = vor.u32 %v4116_v50, %v2790_v53  ;;  %v3273_v50 = vor.u32 %v4236_v41, %v3270_v42  ;;  %v4230_v53 = vld [vmem:[#allocation2 + $0x3a4] sm:$0xf]  ;;  %v345_v41 = vperm.slane %v4604_v7, 2  ;;  %v4409_v7 = vld [vmem:[%s4807_s3 + $0x38] sm:$0xff] }
  0xfc   :  { %2209 = vmatpush.bf16.msrb.mxu2 %v2889_v56  ;;  %v1970_v56 = vpop.f32.mrf.mxu3  ;;  %v2985_v5 = vor.u32 %v4164_v54, %v2982_v55  ;;  %v3246_v54 = vld [vmem:[#allocation2 + $0x3b8] sm:$0xf0]  ;;  %v4278_v55 = vld [vmem:[#allocation2 + $0x524] sm:$0xf] }
  0xfd   :  { %2222 = vmatpush.bf16.msrb.mxu3 %v3081_v62  ;;  %v4350_v62 = vld [vmem:[#allocation2 + $0x764] sm:$0xf] }
  0xfe   :  { %2184 = vmatpush.bf16.msrb.mxu0 %v3629_v8  ;;  %v3345_v8 = vor.u32 %v4254_v57, %v3342_v58  ;;  %v3438_v57 = vld [vmem:[#allocation2 + $0x538] sm:$0xf0]  ;;  %v4326_v58 = vld [vmem:[#allocation2 + $0x6a4] sm:$0xf] }
  0xff   :  { %2197 = vmatpush.bf16.msrb.mxu1 %v3821_v9  ;;  %v3537_v9 = vor.u32 %v4302_v59, %v3534_v61  ;;  %v3630_v59 = vld [vmem:[#allocation2 + $0x6b8] sm:$0xf0] }
 0x100   :  { %2210 = vmatpush.bf16.msrb.mxu2 %v2865_v10  ;;  %v3729_v10 = vor.u32 %v4350_v62, %v3726_v63  ;;  %v3822_v61 = vld [vmem:[#allocation2 + $0x838] sm:$0xf0]  ;;  %v3249_v62 = vor.u32 %v4230_v53, %v3246_v54  ;;  %v3441_v63 = vor.u32 %v4278_v55, %v3438_v57 }
 0x101   :  { %2223 = vmatpush.bf16.msrb.mxu3 %v3057_v39  ;;  %v3510_v39 = vld [vmem:[#allocation2 + $0x5c8] sm:$0xf0]  ;;  %v4417_v55 = vld [vmem:[%s4807_s3 + $0x78] sm:$0xff] }
 0x102   :  { %2185 = vmatpush.bf16.msrb.mxu0 %v3605_v25  ;;  %v3513_v23 = vor.u32 %v4296_v12, %v3510_v39  ;;  %v4242_v25 = vld [vmem:[#allocation2 + $0x404] sm:$0xf]  ;;  %v3798_v12 = vld [vmem:[#allocation2 + $0x808] sm:$0xf0] }
 0x103   :  { %2198 = vmatpush.bf16.msrb.mxu1 %v3797_v28  ;;  %v4290_v28 = vld [vmem:[#allocation2 + $0x584] sm:$0xf]  ;;  %v3297_v36 = vor.u32 %v4242_v25, %v3294_v27  ;;  %v3801_v25 = vor.u32 %v4368_v11, %v3798_v12  ;;  %v3390_v27 = vld [vmem:[#allocation2 + $0x4d8] sm:$0xf0] }
 0x104   :  { %2211 = vmatpush.bf16.msrb.mxu2 %v2841_v29  ;;  %v3897_v29 = vor.u32 %v4392_v16, %v3894_v17  ;;  %v3489_v37 = vor.u32 %v4290_v28, %v3486_v30  ;;  %v4314_v28 = vld [vmem:[#allocation2 + $0x644] sm:$0xf] }
 0x105   :  { %2224 = vmatpush.bf16.msrb.mxu3 %v3033_v34  ;;  %v3870_v34 = vld [vmem:[#allocation2 + $0x898] sm:$0xf0]  ;;  %v4362_v30 = vld [vmem:[#allocation2 + $0x7c4] sm:$0xf] }
 0x106   :  { %2186 = vmatpush.bf16.msrb.mxu0 %v3581_v43  ;;  %v4284_v43 = vld [vmem:[#allocation2 + $0x554] sm:$0xf]  ;;  %v3873_v44 = vor.u32 %v4386_v33, %v3870_v34  ;;  %v3777_v42 = vor.u32 %v4362_v30, %v3774_v31  ;;  %v4410_v31 = vld [vmem:[%s4807_s3 + $0x40] sm:$0xff] }
 0x107   :  { %2199 = vmatpush.bf16.msrb.mxu1 %v3773_v46  ;;  %v4332_v46 = vld [vmem:[#allocation2 + $0x6d4] sm:$0xf] }
 0x108   :  { %2212 = vmatpush.bf16.msrb.mxu2 %v2817_v47  ;;  %v3654_v47 = vld [vmem:[#allocation2 + $0x6e8] sm:$0xf0]  ;;  %v4212_v33 = vld [vmem:[#allocation2 + $0x314] sm:$0xf] }
 0x109   :  { %2225 = vmatpush.bf16.msrb.mxu3 %v3009_v52  ;;  %v3657_v52 = vor.u32 %v4332_v46, %v3654_v47  ;;  %v4356_v47 = vld [vmem:[#allocation2 + $0x794] sm:$0xf] }
 0x10a   :  { %2187 = vmatpush.bf16.msrb.mxu0 %v3557_v60  ;;  %v4630_v49 = vpop.f32.mrf.mxu0  ;;  %v4374_v60 = vld [vmem:[#allocation2 + $0x824] sm:$0xf] }
 0x10b   :  { %2200 = vmatpush.bf16.msrb.mxu1 %v3749_v0  ;;  %v4632_v51 = vpop.f32.mrf.mxu1  ;;  %v3633_v0 = vor.u32 %v4326_v58, %v3630_v59  ;;  %v1982_v53 = vadd.f32 %v4630_v49, %v345_v41  ;;  %v4408_v49 = vld [vmem:[%s4807_s3 + $0x30] sm:$0xff]  ;;  %v4433_v58 = vld [vmem:[%s4807_s3 + $0xf8] sm:$0xff] }
 0x10c   :  { %2213 = vmatpush.bf16.msrb.mxu2 %v2793_v1  ;;  %v4224_v1 = vld [vmem:[#allocation2 + $0x374] sm:$0xf] }
 0x10d   :  { %2226 = vmatpush.bf16.msrb.mxu3 %v2985_v5  ;;  %2188 = vmatmul.bf16.vlgmr.msrb.gmra.mxu0 %v4581_v35  ;;  %v3825_v5 = vor.u32 %v4374_v60, %v3822_v61  ;;  %v3225_v14 = vor.u32 %v4224_v1, %v3222_v2  ;;  %v1995_v57 = vadd.f32 %v4632_v51, %v1982_v53  ;;  %v4416_v59 = vld [vmem:[%s4807_s3 + $0x70] sm:$0xff]  ;;  %v4407_v61 = vld [vmem:[%s4807_s3 + $0x28] sm:$0xff]  ;;  %v4414_v2 = vld [vmem:[%s4807_s3 + $0x60] sm:$0xff] }
 0x10e   :  { %2232 = vmatpush.bf16.msra.mxu0 %v3345_v8  ;;  %2201 = vmatmul.bf16.vlgmr.msrb.gmra.mxu1 %v4583_v38  ;;  %v3414_v8 = vld [vmem:[#allocation2 + $0x508] sm:$0xf0]  ;;  %v4424_v51 = vld [vmem:[%s4807_s3 + $0xb0] sm:$0xff] }
 0x10f   :  { %2245 = vmatpush.bf16.msra.mxu1 %v3537_v9  ;;  %2214 = vmatmul.bf16.vlgmr.msrb.gmra.mxu2 %v4568_v19  ;;  %v3846_v19 = vld [vmem:[#allocation2 + $0x868] sm:$0xf0]  ;;  %v4320_v9 = vld [vmem:[#allocation2 + $0x674] sm:$0xf]  ;;  %v3417_v16 = vor.u32 %v4272_v4, %v3414_v8  ;;  %v4422_v4 = vld [vmem:[%s4807_s3 + $0xa0] sm:$0xff] }
 0x110   :  { %2258 = vmatpush.bf16.msra.mxu2 %v3729_v10  ;;  %2227 = vmatmul.bf16.vlgmr.msrb.gmra.mxu3 %v4572_v22  ;;  %v3465_v22 = vor.u32 %v4284_v43, %v3462_v45  ;;  %v3849_v56 = vor.u32 %v4380_v48, %v3846_v19  ;;  %v3606_v10 = vld [vmem:[#allocation2 + $0x688] sm:$0xf0]  ;;  %v4405_v8 = vld [vmem:[%s4807_s3 + $0x18] sm:$0xff] }
 0x111   :  { %2271 = vmatpush.bf16.msra.mxu3 %v3921_v13  ;;  %v3609_v17 = vor.u32 %v4320_v9, %v3606_v10  ;;  %v3366_v43 = vld [vmem:[#allocation2 + $0x4a8] sm:$0xf0]  ;;  %v4430_v9 = vld [vmem:[%s4807_s3 + $0xe0] sm:$0xff]  ;;  %v4413_v10 = vld [vmem:[%s4807_s3 + $0x58] sm:$0xff] }
 0x112   :  { %2233 = vmatpush.bf16.msra.mxu0 %v3321_v21  ;;  %v4634_v3 = vpop.f32.mrf.mxu2  ;;  %v1983_v13 = vpop.f32.mrf.mxu0  ;;  %v4218_v21 = vld [vmem:[#allocation2 + $0x344] sm:$0xf]  ;;  %v3558_v45 = vld [vmem:[#allocation2 + $0x628] sm:$0xf0] }
 0x113   :  { %2246 = vmatpush.bf16.msra.mxu1 %v3513_v23  ;;  %v4636_v39 = vpop.f32.mrf.mxu3  ;;  %v1996_v15 = vpop.f32.mrf.mxu1  ;;  %v3198_v23 = vld [vmem:[#allocation2 + $0x358] sm:$0xf0]  ;;  %v3750_v48 = vld [vmem:[#allocation2 + $0x7a8] sm:$0xf0]  ;;  %v2008_v60 = vadd.f32 %v4634_v3, %v1995_v57 }
 0x114   :  { %2259 = vmatpush.bf16.msra.mxu2 %v3705_v24  ;;  %v4266_v24 = vld [vmem:[#allocation2 + $0x4c4] sm:$0xf]  ;;  %v3201_v32 = vor.u32 %v4218_v21, %v3198_v23  ;;  %v3753_v54 = vor.u32 %v4356_v47, %v3750_v48  ;;  %v4431_v1 = vld [vmem:[%s4807_s3 + $0xe8] sm:$0xff]  ;;  %v4421_v3 = vld [vmem:[%s4807_s3 + $0x98] sm:$0xff] }
 0x115   :  { %2272 = vmatpush.bf16.msra.mxu3 %v3897_v29  ;;  %v3582_v29 = vld [vmem:[#allocation2 + $0x658] sm:$0xf0]  ;;  %v3393_v34 = vor.u32 %v4266_v24, %v3390_v27  ;;  %v4420_v21 = vld [vmem:[%s4807_s3 + $0x90] sm:$0xff]  ;;  %v4403_v23 = vld [vmem:[%s4807_s3 + $0x8] sm:$0xff] }
 0x116   :  { %2234 = vmatpush.bf16.msra.mxu0 %v3297_v36  ;;  %v3585_v36 = vor.u32 %v4314_v28, %v3582_v29  ;;  %v4428_v24 = vld [vmem:[%s4807_s3 + $0xd0] sm:$0xff]  ;;  %v4402_v29 = vld [vmem:[%s4807_s3] sm:$0xff] }
 0x117   :  { %2247 = vmatpush.bf16.msra.mxu1 %v3489_v37  ;;  %v3174_v37 = vld [vmem:[#allocation2 + $0x328] sm:$0xf0]  ;;  %v4440_v48 = vld [vmem:[%s4807_s3 + $0x130] sm:$0xff] }
 0x118   :  { %2260 = vmatpush.bf16.msra.mxu2 %v3681_v40  ;;  %v4260_v40 = vld [vmem:[#allocation2 + $0x494] sm:$0xf] }
 0x119   :  { %2273 = vmatpush.bf16.msra.mxu3 %v3873_v44  ;;  %v4308_v44 = vld [vmem:[#allocation2 + $0x614] sm:$0xf] }
 0x11a   :  { %2235 = vmatpush.bf16.msra.mxu0 %v3273_v50  ;;  %v2009_v46 = vpop.f32.mrf.mxu2  ;;  %v3177_v50 = vor.u32 %v4212_v33, %v3174_v37  ;;  %v4748_v37 = vld [vmem:[%s4806_s2] sm:$0x3f] }
 0x11b   :  { %2248 = vmatpush.bf16.msra.mxu1 %v3465_v22  ;;  %v2022_v19 = vpop.f32.mrf.mxu3  ;;  %v3369_v22 = vor.u32 %v4260_v40, %v3366_v43  ;;  %v346_v40 = vperm.slane %v4748_v37, 3  ;;  %v4426_v43 = vld [vmem:[%s4807_s3 + $0xc0] sm:$0xff] }
 0x11c   :  { %2261 = vmatpush.bf16.msra.mxu2 %v3657_v52  ;;  %v3561_v52 = vor.u32 %v4308_v44, %v3558_v45 }
 0x11d   :  { %2274 = vmatpush.bf16.msra.mxu3 %v3849_v56  ;;  %v4425_v56 = vld [vmem:[%s4807_s3 + $0xb8] sm:$0xff] }
 0x11e   :  { %2236 = vmatpush.bf16.msra.mxu0 %v3249_v62  ;;  %v4432_v62 = vld [vmem:[%s4807_s3 + $0xf0] sm:$0xff] }
 0x11f   :  { %2249 = vmatpush.bf16.msra.mxu1 %v3441_v63  ;;  %v4406_v63 = vld [vmem:[%s4807_s3 + $0x20] sm:$0xff] }
 0x120   :  { %2262 = vmatpush.bf16.msra.mxu2 %v3633_v0 }
 0x121   :  { %2275 = vmatpush.bf16.msra.mxu3 %v3825_v5 }
 0x122   :  { %2237 = vmatpush.bf16.msra.mxu0 %v3225_v14  ;;  %v4404_v14 = vld [vmem:[%s4807_s3 + $0x10] sm:$0xff] }
 0x123   :  { %2250 = vmatpush.bf16.msra.mxu1 %v3417_v16  ;;  %v4429_v16 = vld [vmem:[%s4807_s3 + $0xd8] sm:$0xff] }
 0x124   :  { %2263 = vmatpush.bf16.msra.mxu2 %v3609_v17  ;;  %v4412_v17 = vld [vmem:[%s4807_s3 + $0x50] sm:$0xff] }
 0x125   :  { %2276 = vmatpush.bf16.msra.mxu3 %v3801_v25  ;;  %v4411_v25 = vld [vmem:[%s4807_s3 + $0x48] sm:$0xff] }
 0x126   :  { %2238 = vmatpush.bf16.msra.mxu0 %v3201_v32  ;;  %v4418_v32 = vld [vmem:[%s4807_s3 + $0x80] sm:$0xff] }
 0x127   :  { %2251 = vmatpush.bf16.msra.mxu1 %v3393_v34  ;;  %v4441_v34 = vld [vmem:[%s4807_s3 + $0x138] sm:$0xff] }
 0x128   :  { %2264 = vmatpush.bf16.msra.mxu2 %v3585_v36 }
 0x129   :  { %2277 = vmatpush.bf16.msra.mxu3 %v3777_v42 }
 0x12a   :  { %2239 = vmatpush.bf16.msra.mxu0 %v3177_v50 }
 0x12b   :  { %2252 = vmatpush.bf16.msra.mxu1 %v3369_v22  ;;  %v2046_v0 = vpop.f32.mrf.mxu1  ;;  %v4439_v22 = vld [vmem:[%s4807_s3 + $0x128] sm:$0xff] }
 0x12c   :  { %2265 = vmatpush.bf16.msra.mxu2 %v3561_v52 }
 0x12d   :  { %2278 = vmatpush.bf16.msra.mxu3 %v3753_v54  ;;  %2240 = vmatmul.bf16.vlgmr.msra.gmra.mxu0 %v4566_v18  ;;  %v4415_v18 = vld [vmem:[%s4807_s3 + $0x68] sm:$0xff] }
 0x12e   :  { %2684 = vmatpush.bf16.msrb.mxu0 %v4409_v7  ;;  %2253 = vmatmul.bf16.vlgmr.msra.gmra.mxu1 %v4570_v20  ;;  %v4423_v20 = vld [vmem:[%s4807_s3 + $0xa8] sm:$0xff] }
 0x12f   :  { %2697 = vmatpush.bf16.msrb.mxu1 %v4417_v55  ;;  %2266 = vmatmul.bf16.vlgmr.msra.gmra.mxu2 %v4581_v35  ;;  %v2021_v35 = vadd.f32 %v4636_v39, %v2008_v60  ;;  %v4438_v55 = vld [vmem:[%s4807_s3 + $0x120] sm:$0xff] }
 0x130   :  { %2710 = vmatpush.bf16.msrb.mxu2 %v4425_v56  ;;  %2279 = vmatmul.bf16.vlgmr.msra.gmra.mxu3 %v4583_v38  ;;  %v2033_v38 = vpop.f32.mrf.mxu0 }
 0x131   :  { %2723 = vmatpush.bf16.msrb.mxu3 %v4433_v58  ;;  %v2034_v5 = vadd.f32 %v2033_v38, %v2021_v35  ;;  %v4437_v58 = vld [vmem:[%s4807_s3 + $0x118] sm:$0xff]  ;;  %v4435_v35 = vld [vmem:[%s4807_s3 + $0x108] sm:$0xff] }
 0x132   :  { %2685 = vmatpush.bf16.msrb.mxu0 %v4408_v49  ;;  %v2059_v11 = vpop.f32.mrf.mxu2 }
 0x133   :  { %2698 = vmatpush.bf16.msrb.mxu1 %v4416_v59  ;;  %v2047_v12 = vadd.f32 %v2046_v0, %v2034_v5  ;;  %v2072_v13 = vpop.f32.mrf.mxu3  ;;  %v2048_v15 = vpop.f32.mrf.mxu1  ;;  %v2060_v45 = vadd.f32 %v2059_v11, %v346_v40  ;;  %v4449_v5 = vld [vmem:[%s4807_s3 + $0x178] sm:$0xff]  ;;  %v4447_v11 = vld [vmem:[%s4807_s3 + $0x168] sm:$0xff] }
 0x134   :  { %2711 = vmatpush.bf16.msrb.mxu2 %v4424_v51 }
 0x135   :  { %2724 = vmatpush.bf16.msrb.mxu3 %v4432_v62  ;;  %4455 = vtanh.f32 %v2047_v12  ;;  %v2073_v46 = vadd.f32 %v2072_v13, %v2060_v45 }
 0x136   :  { %2686 = vmatpush.bf16.msrb.mxu0 %v4407_v61  ;;  %4457 = vtanh.f32 %v4614_v6  ;;  %v4419_v6 = vld [vmem:[%s4807_s3 + $0x88] sm:$0xff] }
 0x137   :  { %2699 = vmatpush.bf16.msrb.mxu1 %v4415_v18  ;;  %4459 = vtanh.f32 %v4624_v26  ;;  %v4427_v26 = vld [vmem:[%s4807_s3 + $0xc8] sm:$0xff] }
 0x138   :  { %2712 = vmatpush.bf16.msrb.mxu2 %v4423_v20  ;;  %v2035_v39 = vpop.f32.mrf.mxu0  ;;  %v4436_v20 = vld [vmem:[%s4807_s3 + $0x110] sm:$0xff] }
 0x139   :  { %2725 = vmatpush.bf16.msrb.mxu3 %v4431_v1 }
 0x13a   :  { %2687 = vmatpush.bf16.msrb.mxu0 %v4406_v63  ;;  %v2061_v27 = vpop.f32.mrf.mxu2 }
 0x13b   :  { %2700 = vmatpush.bf16.msrb.mxu1 %v4414_v2  ;;  %v2074_v28 = vpop.f32.mrf.mxu3  ;;  %v4456_v30 = vpop.eup %4455  ;;  %v4434_v2 = vld [vmem:[%s4807_s3 + $0x100] sm:$0xff] }
 0x13c   :  { %2713 = vmatpush.bf16.msrb.mxu2 %v4422_v4  ;;  %v4458_v33 = vpop.eup %4457  ;;  %v2292_v41 = vpack.c.bf16 %v4456_v30, %v4456_v30  ;;  %v347_v4 = vperm.slane %v4748_v37, 4 }
 0x13d   :  { %2726 = vmatpush.bf16.msrb.mxu3 %v4430_v9  ;;  %v4460_v36 = vpop.eup %4459  ;;  %v2290_v42 = vpack.c.bf16 %v4458_v33, %v4458_v33 }
 0x13e   :  { %2688 = vmatpush.bf16.msrb.mxu0 %v4405_v8  ;;  %v2291_v44 = vpack.c.bf16 %v4460_v36, %v4460_v36  ;;  %v4448_v8 = vld [vmem:[%s4807_s3 + $0x170] sm:$0xff] }
 0x13f   :  { %2701 = vmatpush.bf16.msrb.mxu1 %v4413_v10 }
 0x140   :  { %2714 = vmatpush.bf16.msrb.mxu2 %v4421_v3 }
 0x141   :  { %2727 = vmatpush.bf16.msrb.mxu3 %v4429_v16 }
 0x142   :  { %2689 = vmatpush.bf16.msrb.mxu0 %v4404_v14  ;;  %v4446_v14 = vld [vmem:[%s4807_s3 + $0x160] sm:$0xff] }
 0x143   :  { %2702 = vmatpush.bf16.msrb.mxu1 %v4412_v17 }
 0x144   :  { %2715 = vmatpush.bf16.msrb.mxu2 %v4420_v21  ;;  %v4445_v21 = vld [vmem:[%s4807_s3 + $0x158] sm:$0xff] }
 0x145   :  { %2728 = vmatpush.bf16.msrb.mxu3 %v4428_v24  ;;  %v4444_v24 = vld [vmem:[%s4807_s3 + $0x150] sm:$0xff] }
 0x146   :  { %2690 = vmatpush.bf16.msrb.mxu0 %v4403_v23 }
 0x147   :  { %2703 = vmatpush.bf16.msrb.mxu1 %v4411_v25 }
 0x148   :  { %2716 = vmatpush.bf16.msrb.mxu2 %v4419_v6 }
 0x149   :  { %2729 = vmatpush.bf16.msrb.mxu3 %v4427_v26 }
 0x14a   :  { %2691 = vmatpush.bf16.msrb.mxu0 %v4402_v29  ;;  %v2085_v47 = vpop.f32.mrf.mxu0  ;;  %v4443_v29 = vld [vmem:[%s4807_s3 + $0x148] sm:$0xff] }
 0x14b   :  { %2704 = vmatpush.bf16.msrb.mxu1 %v4410_v31  ;;  %v2086_v19 = vadd.f32 %v2085_v47, %v2073_v46  ;;  %v2098_v50 = vpop.f32.mrf.mxu1  ;;  %v4442_v31 = vld [vmem:[%s4807_s3 + $0x140] sm:$0xff] }
 0x14c   :  { %2717 = vmatpush.bf16.msrb.mxu2 %v4418_v32 }
 0x14d   :  { %2692 = vmatmul.bf16.vlgmr.msrb.gmra.mxu0 %v2290_v42  ;;  %2730 = vmatpush.bf16.msrb.mxu3 %v4426_v43  ;;  %v2099_v52 = vadd.f32 %v2098_v50, %v2086_v19 }
 0x14e   :  { %2736 = vmatpush.bf16.msra.mxu0 %v4441_v34  ;;  %2705 = vmatmul.bf16.vlgmr.msrb.gmra.mxu1 %v2291_v44  ;;  %v348_v34 = vperm.slane %v4748_v37, 5 }
 0x14f   :  { %2718 = vmatmul.bf16.vlgmr.msrb.gmra.mxu2 %v2292_v41  ;;  %2749 = vmatpush.bf16.msra.mxu1 %v4449_v5 }
 0x152   :  { %2737 = vmatpush.bf16.msra.mxu0 %v4440_v48  ;;  %v2111_v53 = vpop.f32.mrf.mxu2  ;;  %v2087_v57 = vpop.f32.mrf.mxu0 }
 0x153   :  { %v2112_v54 = vadd.f32 %v2111_v53, %v2099_v52  ;;  %v2124_v7 = vpop.f32.mrf.mxu3  ;;  %v2100_v49 = vpop.f32.mrf.mxu1  ;;  %2750 = vmatpush.bf16.msra.mxu1 %v4448_v8 }
 0x155   :  { %v2125_v56 = vadd.f32 %v2124_v7, %v2112_v54  ;;  %v4454_v7 = vld [vmem:[#allocation4] ss:$0 sm:$0xff] }
 0x156   :  { %2738 = vmatpush.bf16.msra.mxu0 %v4439_v22 }
 0x157   :  { %4461 = vtanh.f32 %v2125_v56  ;;  %2751 = vmatpush.bf16.msra.mxu1 %v4447_v11 }
 0x15a   :  { %2739 = vmatpush.bf16.msra.mxu0 %v4438_v55  ;;  %v2113_v59 = vpop.f32.mrf.mxu2 }
 0x15b   :  { %v2126_v51 = vpop.f32.mrf.mxu3  ;;  %2752 = vmatpush.bf16.msra.mxu1 %v4446_v14 }
 0x15d   :  { %v4462_v60 = vpop.eup %4461 }
 0x15e   :  { %2740 = vmatpush.bf16.msra.mxu0 %v4437_v58  ;;  %v2293_v61 = vpack.c.bf16 %v4462_v60, %v4462_v60 }
 0x15f   :  { %2753 = vmatpush.bf16.msra.mxu1 %v4445_v21 }
 0x160   :  { %2731 = vmatmul.bf16.vlgmr.msrb.gmra.mxu3 %v2293_v61 }
 0x162   :  { %2741 = vmatpush.bf16.msra.mxu0 %v4436_v20 }
 0x163   :  { %2754 = vmatpush.bf16.msra.mxu1 %v4444_v24 }
 0x166   :  { %2742 = vmatpush.bf16.msra.mxu0 %v4435_v35 }
 0x167   :  { %2755 = vmatpush.bf16.msra.mxu1 %v4443_v29 }
 0x16a   :  { %v2137_v62 = vpop.f32.mrf.mxu0  ;;  %2743 = vmatpush.bf16.msra.mxu0 %v4434_v2 }
 0x16b   :  { %v2150_v18 = vpop.f32.mrf.mxu1  ;;  %v2138_v9 = vadd.f32 %v2137_v62, %v347_v4  ;;  %2756 = vmatpush.bf16.msra.mxu1 %v4442_v31 }
 0x16d   :  { %v2151_v12 = vadd.f32 %v2150_v18, %v2138_v9 }
 0x172   :  { %v2163_v38 = vpop.f32.mrf.mxu2  ;;  %v2139_v63 = vpop.f32.mrf.mxu0 }
 0x173   :  { %v2176_v0 = vpop.f32.mrf.mxu3  ;;  %v2152_v1 = vpop.f32.mrf.mxu1  ;;  %v2164_v13 = vadd.f32 %v2163_v38, %v2151_v12 }
 0x175   :  { %v2177_v39 = vadd.f32 %v2176_v0, %v2164_v13 }
 0x17a   :  { %v2165_v10 = vpop.f32.mrf.mxu2 }
 0x17b   :  { %v2178_v3 = vpop.f32.mrf.mxu3 }
 0x18a   :  { %v2189_v15 = vpop.f32.mrf.mxu0 }
 0x18b   :  { %v2190_v16 = vadd.f32 %v2189_v15, %v2177_v39  ;;  %v2202_v17 = vpop.f32.mrf.mxu1 }
 0x18d   :  { %v2203_v23 = vadd.f32 %v2202_v17, %v2190_v16 }
 0x18f   :  { %4463 = vtanh.f32 %v2203_v23 }
 0x192   :  { %v2215_v25 = vpop.f32.mrf.mxu2  ;;  %v2191_v27 = vpop.f32.mrf.mxu0 }
 0x193   :  { %v2228_v6 = vpop.f32.mrf.mxu3  ;;  %v2204_v28 = vpop.f32.mrf.mxu1  ;;  %v2216_v36 = vadd.f32 %v2215_v25, %v348_v34 }
 0x195   :  { %v4464_v26 = vpop.eup %4463  ;;  %v2229_v40 = vadd.f32 %v2228_v6, %v2216_v36 }
 0x196   :  { %v2294_v30 = vpack.c.bf16 %v4464_v26, %v4464_v26 }
 0x198   :  { %2744 = vmatmul.bf16.vlgmr.msra.gmra.mxu0 %v2294_v30 }
 0x19a   :  { %v2217_v32 = vpop.f32.mrf.mxu2 }
 0x19b   :  { %v2230_v33 = vpop.f32.mrf.mxu3 }
 0x1aa   :  { %v2241_v41 = vpop.f32.mrf.mxu0 }
 0x1ab   :  { %v2254_v42 = vpop.f32.mrf.mxu1  ;;  %v2242_v43 = vadd.f32 %v2241_v41, %v2229_v40 }
 0x1ad   :  { %v2255_v44 = vadd.f32 %v2254_v42, %v2242_v43 }
 0x1b2   :  { %v2267_v45 = vpop.f32.mrf.mxu2  ;;  %v2243_v48 = vpop.f32.mrf.mxu0 }
 0x1b3   :  { %v2280_v46 = vpop.f32.mrf.mxu3  ;;  %v2268_v47 = vadd.f32 %v2267_v45, %v2255_v44  ;;  %v2256_v19 = vpop.f32.mrf.mxu1 }
 0x1b5   :  { %v2281_v50 = vadd.f32 %v2280_v46, %v2268_v47 }
 0x1b7   :  { %4465 = vtanh.f32 %v2281_v50 }
 0x1ba   :  { %v2269_v22 = vpop.f32.mrf.mxu2 }
 0x1bb   :  { %v2282_v52 = vpop.f32.mrf.mxu3 }
 0x1bd   :  { %v4466_v53 = vpop.eup %4465 }
 0x1be   :  { %v2295_v54 = vpack.c.bf16 %v4466_v53, %v4466_v53 }
 0x1c0   :  { %2757 = vmatmul.bf16.vlgmr.msra.gmra.mxu1 %v2295_v54 }
 0x1ca   :  { %v2693_v37 = vpop.f32.mrf.mxu0 }
 0x1cb   :  { %v2694_v55 = vadd.f32 %v4454_v7, %v2693_v37  ;;  %v2706_v56 = vpop.f32.mrf.mxu1 }
 0x1cd   :  { %v2707_v57 = vadd.f32 %v2706_v56, %v2694_v55 }
 0x1d2   :  { %v2719_v49 = vpop.f32.mrf.mxu2  ;;  %v2695_v59 = vpop.f32.mrf.mxu0 }
 0x1d3   :  { %v2720_v58 = vadd.f32 %v2719_v49, %v2707_v57  ;;  %v2708_v51 = vpop.f32.mrf.mxu1 }
 0x1da   :  { %v2721_v60 = vpop.f32.mrf.mxu2 }
 0x1e3   :  { %v2732_v61 = vpop.f32.mrf.mxu3 }
 0x1e4   :  { %v2733_v62 = vadd.f32 %v2732_v61, %v2720_v58 }
 0x1eb   :  { %v2734_v18 = vpop.f32.mrf.mxu3 }
 0x215   :  { %v2745_v20 = vpop.f32.mrf.mxu0 }
 0x216   :  { %v2746_v38 = vadd.f32 %v2745_v20, %v2733_v62 }
 0x21d   :  { %v2747_v35 = vpop.f32.mrf.mxu0 }
 0x23d   :  { %v2758_v63 = vpop.f32.mrf.mxu1 }
 0x23e   :  { %v2759_v0 = vadd.f32 %v2758_v63, %v2746_v38 }
 0x240   :  { %2763 = vst.msk [vmem:[%s4809_s5] sm:$0xff] %vm2762_vm0, %v2759_v0 }
 0x245   :  { %v2760_v1 = vpop.f32.mrf.mxu1 }
 0x246   :  { %2768 = vsyncpa [#allocation3], 1 }
 0x247   :  { %2769 = vsyncpa [#allocation5], 1 }

</bundles_post_ra>
